<compile_context>
chip_gen: v6e
topology: v6e:2x2x1
jax: 0.10.0
libtpu: 0.0.40
codegen_flags: <defaults>
</compile_context>

<pallas_src>
import math
from functools import partial

import jax
import jax.numpy as jnp
from jax.experimental import pallas as pl
from jax.experimental.pallas import tpu as pltpu

_VMEM_LIMIT = 64 * 1024 * 1024  # raise scoped VMEM (defaults: 16/32/32 MiB)


def _pick_block(total: int, target: int) -> int:
    """Largest block <= target that divides `total` and is 8-aligned (or full)."""
    if total <= target:
        return total
    for b in range(min(target, total), 0, -1):
        if total % b == 0 and (b % 8 == 0 or b == total):
            return b
    return total


# ----------------------------- Pallas kernels ------------------------------

def _linear_kernel(x_ref, w_ref, b_ref, o_ref):
    # x: (BM, E_in) bf16, w: (E_in, E_out) bf16 (resident across grid),
    # b: (1, E_out) f32 -> o: (BM, E_out); f32 MXU accumulation.
    y = jnp.dot(x_ref[...], w_ref[...], preferred_element_type=jnp.float32)
    o_ref[...] = (y + b_ref[...]).astype(o_ref.dtype)


def _fused_attn_kernel(q_ref, k_ref, v_ref, attn_ref, ctx_ref, *, scaling):
    # Per grid step: a block of B=(h,n) pairs and a block of query columns.
    #   q   : (B, Cq, RD) bf16      k, v : (B, C, RD) bf16
    #   attn: (B, Cq, C)  f32       ctx  : (B, Cq, RD) bf16
    s = jnp.einsum("bqd,bkd->bqk", q_ref[...], k_ref[...],
                   preferred_element_type=jnp.float32)
    # Scale the (Cq, C) logits instead of the (Cq, R*D) queries (fewer elems).
    s = s * scaling
    m = jnp.max(s, axis=-1, keepdims=True)
    p = jnp.exp(s - m)
    denom = jnp.sum(p, axis=-1, keepdims=True)
    attn = p * pl.reciprocal(denom, approx=True)      # EUP slot, off VALU path
    attn_ref[...] = attn
    ctx = jnp.einsum("bqk,bkd->bqd", attn.astype(v_ref.dtype), v_ref[...],
                     preferred_element_type=jnp.float32)
    ctx_ref[...] = ctx.astype(ctx_ref.dtype)


# ----------------------------- pallas_call wrappers -------------------------

def linear_tiled(x2d, w, b, *, out_dtype, block_m=512):
    """y = x2d @ w + b, tiled over the token axis M; W/b stay VMEM-resident."""
    M, E_in = x2d.shape
    E_out = w.shape[1]
    bm = _pick_block(M, block_m)
    grid = (M // bm,)
    return pl.pallas_call(
        _linear_kernel,
        grid=grid,
        in_specs=[
            pl.BlockSpec((bm, E_in), lambda i: (i, 0)),
            pl.BlockSpec((E_in, E_out), lambda i: (0, 0)),   # resident weight
            pl.BlockSpec((1, E_out), lambda i: (0, 0)),      # resident bias
        ],
        out_specs=pl.BlockSpec((bm, E_out), lambda i: (i, 0)),
        out_shape=jax.ShapeDtypeStruct((M, E_out), out_dtype),
        compiler_params=pltpu.CompilerParams(
            dimension_semantics=("parallel",),
            vmem_limit_bytes=_VMEM_LIMIT),
    )(x2d, w, b.reshape(1, E_out))


def fused_tied_attention(q_hn, k_hn, v_hn, *, scaling, block_b=8, block_q=256):
    """q/k/v: (H*N, C, R*D) bf16 -> (attn (H*N,C,C) f32, ctx (H*N,C,R*D) bf16)."""
    B, C, RD = q_hn.shape
    bb = _pick_block(B, block_b)   # several (h, n) pairs per grid step
    cq = _pick_block(C, block_q)   # query-column tiling (full C softmax kept)
    grid = (B // bb, C // cq)
    qctx_spec = pl.BlockSpec((bb, cq, RD), lambda b, qi: (b, qi, 0))
    kv_spec = pl.BlockSpec((bb, C, RD), lambda b, qi: (b, 0, 0))
    attn_spec = pl.BlockSpec((bb, cq, C), lambda b, qi: (b, qi, 0))
    # TODO(synk): for very large C / R*D (v7x 64 MiB VMEM) tile the key axis
    #             with an online softmax and the R*D contraction with an f32
    #             accumulator + @pl.when init/finalize.
    return pl.pallas_call(
        partial(_fused_attn_kernel, scaling=scaling),
        grid=grid,
        in_specs=[qctx_spec, kv_spec, kv_spec],
        out_specs=(attn_spec, qctx_spec),
        out_shape=(jax.ShapeDtypeStruct((B, C, C), jnp.float32),
                   jax.ShapeDtypeStruct((B, C, RD), jnp.bfloat16)),
        compiler_params=pltpu.CompilerParams(
            dimension_semantics=("parallel", "parallel"),
            vmem_limit_bytes=_VMEM_LIMIT),
    )(q_hn, k_hn, v_hn)


# ----------------------------- Forward pass ---------------------------------

def row_self_attention_forward(x, params, *, num_heads):
    """Replicates RowSelfAttention.forward (no masks, dropout p=0 / eval).

    Returns (out, attention) with out: (R, C, N, E) f32, attention: (H, N, C, C) f32.
    """
    # TODO(synk): self_attention_mask raises NotImplementedError in the module;
    # self_attention_padding_mask / dropout(p>0) / batched_forward chunking not
    # implemented here.
    R, C, N, E = x.shape
    H = num_heads
    D = E // H
    scaling = (D ** -0.5) / math.sqrt(R)  # align_scaling(q)

    # ---- fused Q/K/V projection: read x once, one MXU pass, bf16 storage ----
    x2d = x.reshape(R * C * N, E).astype(jnp.bfloat16)
    # PyTorch Linear: y = x @ W.T + b ; concatenate as [q | k | v] on out axis.
    wqkv = jnp.concatenate(
        [params["wq"].T, params["wk"].T, params["wv"].T], axis=1
    ).astype(jnp.bfloat16)                                        # (E, 3E)
    bqkv = jnp.concatenate([params["bq"], params["bk"], params["bv"]])  # f32
    qkv = linear_tiled(x2d, wqkv, bqkv, out_dtype=jnp.bfloat16)   # (M, 3E)

    # glue: (M,3E) -> (R,C,N,3,H,D) -> (3,H,N,C,R,D) -> (3, H*N, C, R*D)
    # TODO(synk): fold this transpose into BlockSpec index_maps.
    qkv = qkv.reshape(R, C, N, 3, H, D)
    qkv = jnp.transpose(qkv, (3, 4, 2, 1, 0, 5)).reshape(3, H * N, C, R * D)
    q_hn, k_hn, v_hn = qkv[0], qkv[1], qkv[2]

    # ---- fused scores -> softmax -> @V (attention never re-read from HBM) ---
    attn, ctx = fused_tied_attention(q_hn, k_hn, v_hn, scaling=scaling)

    # glue back: (H*N,C,R*D) -> (H,N,C,R,D) -> (R,C,N,H,D) -> (M, E)
    ctx = ctx.reshape(H, N, C, R, D)
    ctx = jnp.transpose(ctx, (3, 2, 1, 0, 4)).reshape(R * C * N, E)

    out = linear_tiled(ctx, params["wo"].T.astype(jnp.bfloat16), params["bo"],
                       out_dtype=jnp.float32).reshape(R, C, N, E)
    return out, attn.reshape(H, N, C, C)


# ----------------------------- Pure-JAX reference ---------------------------

def reference_forward(x, params, *, num_heads):
    R, C, N, E = x.shape
    H = num_heads
    D = E // H
    scaling = (D ** -0.5) / math.sqrt(R)

    def lin(t, w, b):
        return t @ w.T + b

    q = lin(x, params["wq"], params["bq"]).reshape(R, C, N, H, D) * scaling
    k = lin(x, params["wk"], params["bk"]).reshape(R, C, N, H, D)
    v = lin(x, params["wv"], params["bv"]).reshape(R, C, N, H, D)
    attn = jnp.einsum("rinhd,rjnhd->hnij", q, k)
    attn = jax.nn.softmax(attn, axis=-1)
    out = jnp.einsum("hnij,rjnhd->rinhd", attn, v).reshape(R, C, N, E)
    out = lin(out, params["wo"], params["bo"])
    return out, attn


# ----------------------------- Main ------------------------------------------

if __name__ == "__main__":
    R, C, N, E, H = 4, 8, 2, 32, 4   # num_rows, num_columns, batch, emb_dim, heads

    key = jax.random.PRNGKey(0)
    ks = jax.random.split(key, 9)
    x = jax.random.normal(ks[0], (R, C, N, E), jnp.float32)

    def init_linear(kw, kb):
        # deterministic stand-in for nn.Linear init
        w = jax.random.uniform(kw, (E, E), jnp.float32, -1.0, 1.0) / math.sqrt(E)
        b = jax.random.uniform(kb, (E,), jnp.float32, -1.0, 1.0) / math.sqrt(E)
        return w, b

    wq, bq = init_linear(ks[1], ks[2])
    wk, bk = init_linear(ks[3], ks[4])
    wv, bv = init_linear(ks[5], ks[6])
    wo, bo = init_linear(ks[7], ks[8])
    params = {"wq": wq, "bq": bq, "wk": wk, "bk": bk,
              "wv": wv, "bv": bv, "wo": wo, "bo": bo}

    fwd = jax.jit(partial(row_self_attention_forward, num_heads=H))
    out, attn = fwd(x, params)
    jax.block_until_ready((out, attn))

    ref_out, ref_attn = reference_forward(x, params, num_heads=H)
    assert out.shape == (R, C, N, E) and attn.shape == (H, N, C, C)
    # bf16 storage + approx reciprocal -> looser tolerances vs f32 reference
    assert jnp.allclose(attn, ref_attn, atol=3e-2, rtol=3e-2), "attention mismatch"
    assert jnp.allclose(out, ref_out, atol=7e-2, rtol=7e-2), "output mismatch"

    print("KERNEL_OK")
</pallas_src>

<mosaic_0001>
module attributes {stable_mosaic.version = 11 : i64} {
  func.func @_linear_kernel(%arg0: i32, %arg1: memref<64x32xbf16, #tpu.memory_space<vmem>>, %arg2: memref<32x96xbf16, #tpu.memory_space<vmem>>, %arg3: memref<1x96xf32, #tpu.memory_space<vmem>>, %arg4: memref<64x96xbf16, #tpu.memory_space<vmem>>) attributes {dimension_semantics = [#tpu.dimension_semantics<parallel>], iteration_bounds = array<i64: 1>, scalar_prefetch = 0 : i64, scratch_operands = 0 : i64, tpu.core_type = #tpu.core_type<tc>, window_params = [{transform_indices = @transform_0, window_bounds = array<i64: 64, 32>}, {pipeline_mode = #tpu.pipeline_mode<synchronous>, transform_indices = @transform_1, window_bounds = array<i64: 32, 96>}, {pipeline_mode = #tpu.pipeline_mode<synchronous>, transform_indices = @transform_2, window_bounds = array<i64: 1, 96>}, {transform_indices = @transform_3, window_bounds = array<i64: 64, 96>}]} {
    %c0 = arith.constant 0 : index
    %c0_0 = arith.constant 0 : index
    %0 = vector.load %arg1[%c0, %c0_0] : memref<64x32xbf16, #tpu.memory_space<vmem>>, vector<64x32xbf16>
    %c0_1 = arith.constant 0 : index
    %c0_2 = arith.constant 0 : index
    %1 = vector.load %arg2[%c0_1, %c0_2] : memref<32x96xbf16, #tpu.memory_space<vmem>>, vector<32x96xbf16>
    %cst = arith.constant dense<0.000000e+00> : vector<64x96xf32>
    %2 = tpu.matmul %0, %1, %cst {dimension_numbers = #tpu.dot_dimension_numbers<[1], [0], [0], [1], [0, 0, 1, 1], [], []>} : vector<64x32xbf16>, vector<32x96xbf16>, vector<64x96xf32> -> vector<64x96xf32>
    %c0_3 = arith.constant 0 : index
    %c0_4 = arith.constant 0 : index
    %3 = vector.load %arg3[%c0_3, %c0_4] : memref<1x96xf32, #tpu.memory_space<vmem>>, vector<1x96xf32>
    %4 = vector.broadcast %3 : vector<1x96xf32> to vector<64x96xf32>
    %5 = arith.addf %2, %4 : vector<64x96xf32>
    %6 = arith.truncf %5 : vector<64x96xf32> to vector<64x96xbf16>
    %c0_5 = arith.constant 0 : index
    %c0_6 = arith.constant 0 : index
    %7 = vector.load %arg4[%c0_5, %c0_6] : memref<64x96xbf16, #tpu.memory_space<vmem>>, vector<64x96xbf16>
    tpu.vector_store %arg4[%c0_5, %c0_6], %6 {strides = array<i32>} : memref<64x96xbf16, #tpu.memory_space<vmem>>, vector<64x96xbf16>,
    return
  }
  func.func @transform_0(%arg0: i32) -> (i32, i32) {
    %c0_i32 = arith.constant 0 : i32
    %c0_i32_0 = arith.constant 0 : i32
    return %arg0, %c0_i32 : i32, i32
  }
  func.func @transform_1(%arg0: i32) -> (i32, i32) {
    %c0_i32 = arith.constant 0 : i32
    %c0_i32_0 = arith.constant 0 : i32
    %c0_i32_1 = arith.constant 0 : i32
    return %c0_i32, %c0_i32_0 : i32, i32
  }
  func.func @transform_2(%arg0: i32) -> (i32, i32) {
    %c0_i32 = arith.constant 0 : i32
    %c0_i32_0 = arith.constant 0 : i32
    %c0_i32_1 = arith.constant 0 : i32
    return %c0_i32, %c0_i32_0 : i32, i32
  }
  func.func @transform_3(%arg0: i32) -> (i32, i32) {
    %c0_i32 = arith.constant 0 : i32
    %c0_i32_0 = arith.constant 0 : i32
    return %arg0, %c0_i32 : i32, i32
  }
}

module attributes {stable_mosaic.version = 11 : i64} {
  func.func @_fused_attn_kernel(%arg0: i32, %arg1: i32, %arg2: memref<8x8x32xbf16, #tpu.memory_space<vmem>>, %arg3: memref<8x8x32xbf16, #tpu.memory_space<vmem>>, %arg4: memref<8x8x32xbf16, #tpu.memory_space<vmem>>, %arg5: memref<8x8x8xf32, #tpu.memory_space<vmem>>, %arg6: memref<8x8x32xbf16, #tpu.memory_space<vmem>>) attributes {dimension_semantics = [#tpu.dimension_semantics<parallel>, #tpu.dimension_semantics<parallel>], iteration_bounds = array<i64: 1, 1>, scalar_prefetch = 0 : i64, scratch_operands = 0 : i64, tpu.core_type = #tpu.core_type<tc>, window_params = [{transform_indices = @transform_0, window_bounds = array<i64: 8, 8, 32>}, {transform_indices = @transform_1, window_bounds = array<i64: 8, 8, 32>}, {transform_indices = @transform_2, window_bounds = array<i64: 8, 8, 32>}, {transform_indices = @transform_3, window_bounds = array<i64: 8, 8, 8>}, {transform_indices = @transform_4, window_bounds = array<i64: 8, 8, 32>}]} {
    %c0 = arith.constant 0 : index
    %c0_0 = arith.constant 0 : index
    %c0_1 = arith.constant 0 : index
    %0 = vector.load %arg2[%c0, %c0_0, %c0_1] : memref<8x8x32xbf16, #tpu.memory_space<vmem>>, vector<8x8x32xbf16>
    %c0_2 = arith.constant 0 : index
    %c0_3 = arith.constant 0 : index
    %c0_4 = arith.constant 0 : index
    %1 = vector.load %arg3[%c0_2, %c0_3, %c0_4] : memref<8x8x32xbf16, #tpu.memory_space<vmem>>, vector<8x8x32xbf16>
    "tpu.trace_start"() <{level = 10 : i32, message = "bqd,bkd->bqk"}> : () -> ()
    %cst = arith.constant dense<0.000000e+00> : vector<8x8x8xf32>
    %2 = tpu.matmul %0, %1, %cst {dimension_numbers = #tpu.dot_dimension_numbers<[2], [2], [1], [1], [0, 0, 0, 1, 1, 1], [0], [0]>} : vector<8x8x32xbf16>, vector<8x8x32xbf16>, vector<8x8x8xf32> -> vector<8x8x8xf32>
    "tpu.trace_stop"() : () -> ()
    %cst_5 = arith.constant 0.176776692 : f32
    %3 = vector.broadcast %cst_5 : f32 to vector<8x8x8xf32>
    %4 = arith.mulf %2, %3 : vector<8x8x8xf32>
    %cst_6 = arith.constant dense<0xFF800000> : vector<8x8xf32>
    %5 = vector.multi_reduction <maximumf>, %4, %cst_6 [2] : vector<8x8x8xf32> to vector<8x8xf32>
    %6 = vector.shape_cast %5 : vector<8x8xf32> to vector<8x8x1xf32>
    %7 = vector.broadcast %6 : vector<8x8x1xf32> to vector<8x8x8xf32>
    %8 = arith.subf %4, %7 : vector<8x8x8xf32>
    %9 = math.exp %8 : vector<8x8x8xf32>
    %cst_7 = arith.constant dense<0.000000e+00> : vector<8x8xf32>
    %10 = vector.multi_reduction <add>, %9, %cst_7 [2] : vector<8x8x8xf32> to vector<8x8xf32>
    %11 = vector.shape_cast %10 : vector<8x8xf32> to vector<8x8x1xf32>
    %12 = tpu.reciprocal %11 {approx = true} : vector<8x8x1xf32> -> vector<8x8x1xf32>
    %13 = vector.broadcast %12 : vector<8x8x1xf32> to vector<8x8x8xf32>
    %14 = arith.mulf %9, %13 : vector<8x8x8xf32>
    %c0_8 = arith.constant 0 : index
    %c0_9 = arith.constant 0 : index
    %c0_10 = arith.constant 0 : index
    %15 = vector.load %arg5[%c0_8, %c0_9, %c0_10] : memref<8x8x8xf32, #tpu.memory_space<vmem>>, vector<8x8x8xf32>
    tpu.vector_store %arg5[%c0_8, %c0_9, %c0_10], %14 {strides = array<i32>} : memref<8x8x8xf32, #tpu.memory_space<vmem>>, vector<8x8x8xf32>,
    %16 = arith.truncf %14 : vector<8x8x8xf32> to vector<8x8x8xbf16>
    %c0_11 = arith.constant 0 : index
    %c0_12 = arith.constant 0 : index
    %c0_13 = arith.constant 0 : index
    %17 = vector.load %arg4[%c0_11, %c0_12, %c0_13] : memref<8x8x32xbf16, #tpu.memory_space<vmem>>, vector<8x8x32xbf16>
    "tpu.trace_start"() <{level = 10 : i32, message = "bqk,bkd->bqd"}> : () -> ()
    %cst_14 = arith.constant dense<0.000000e+00> : vector<8x8x32xf32>
    %18 = tpu.matmul %16, %17, %cst_14 {dimension_numbers = #tpu.dot_dimension_numbers<[2], [1], [1], [2], [0, 0, 0, 1, 1, 2], [0], [0]>} : vector<8x8x8xbf16>, vector<8x8x32xbf16>, vector<8x8x32xf32> -> vector<8x8x32xf32>
    "tpu.trace_stop"() : () -> ()
    %19 = arith.truncf %18 : vector<8x8x32xf32> to vector<8x8x32xbf16>
    %c0_15 = arith.constant 0 : index
    %c0_16 = arith.constant 0 : index
    %c0_17 = arith.constant 0 : index
    %20 = vector.load %arg6[%c0_15, %c0_16, %c0_17] : memref<8x8x32xbf16, #tpu.memory_space<vmem>>, vector<8x8x32xbf16>
    tpu.vector_store %arg6[%c0_15, %c0_16, %c0_17], %19 {strides = array<i32>} : memref<8x8x32xbf16, #tpu.memory_space<vmem>>, vector<8x8x32xbf16>,
    return
  }
  func.func @transform_0(%arg0: i32, %arg1: i32) -> (i32, i32, i32) {
    %c0_i32 = arith.constant 0 : i32
    %c0_i32_0 = arith.constant 0 : i32
    return %arg0, %arg1, %c0_i32 : i32, i32, i32
  }
  func.func @transform_1(%arg0: i32, %arg1: i32) -> (i32, i32, i32) {
    %c0_i32 = arith.constant 0 : i32
    %c0_i32_0 = arith.constant 0 : i32
    %c0_i32_1 = arith.constant 0 : i32
    return %arg0, %c0_i32, %c0_i32_0 : i32, i32, i32
  }
  func.func @transform_2(%arg0: i32, %arg1: i32) -> (i32, i32, i32) {
    %c0_i32 = arith.constant 0 : i32
    %c0_i32_0 = arith.constant 0 : i32
    %c0_i32_1 = arith.constant 0 : i32
    return %arg0, %c0_i32, %c0_i32_0 : i32, i32, i32
  }
  func.func @transform_3(%arg0: i32, %arg1: i32) -> (i32, i32, i32) {
    %c0_i32 = arith.constant 0 : i32
    %c0_i32_0 = arith.constant 0 : i32
    return %arg0, %arg1, %c0_i32 : i32, i32, i32
  }
  func.func @transform_4(%arg0: i32, %arg1: i32) -> (i32, i32, i32) {
    %c0_i32 = arith.constant 0 : i32
    %c0_i32_0 = arith.constant 0 : i32
    return %arg0, %arg1, %c0_i32 : i32, i32, i32
  }
}

module attributes {stable_mosaic.version = 11 : i64} {
  func.func @_linear_kernel(%arg0: i32, %arg1: memref<64x32xbf16, #tpu.memory_space<vmem>>, %arg2: memref<32x32xbf16, #tpu.memory_space<vmem>>, %arg3: memref<1x32xf32, #tpu.memory_space<vmem>>, %arg4: memref<64x32xf32, #tpu.memory_space<vmem>>) attributes {dimension_semantics = [#tpu.dimension_semantics<parallel>], iteration_bounds = array<i64: 1>, scalar_prefetch = 0 : i64, scratch_operands = 0 : i64, tpu.core_type = #tpu.core_type<tc>, window_params = [{transform_indices = @transform_0, window_bounds = array<i64: 64, 32>}, {pipeline_mode = #tpu.pipeline_mode<synchronous>, transform_indices = @transform_1, window_bounds = array<i64: 32, 32>}, {pipeline_mode = #tpu.pipeline_mode<synchronous>, transform_indices = @transform_2, window_bounds = array<i64: 1, 32>}, {transform_indices = @transform_3, window_bounds = array<i64: 64, 32>}]} {
    %c0 = arith.constant 0 : index
    %c0_0 = arith.constant 0 : index
    %0 = vector.load %arg1[%c0, %c0_0] : memref<64x32xbf16, #tpu.memory_space<vmem>>, vector<64x32xbf16>
    %c0_1 = arith.constant 0 : index
    %c0_2 = arith.constant 0 : index
    %1 = vector.load %arg2[%c0_1, %c0_2] : memref<32x32xbf16, #tpu.memory_space<vmem>>, vector<32x32xbf16>
    %cst = arith.constant dense<0.000000e+00> : vector<64x32xf32>
    %2 = tpu.matmul %0, %1, %cst {dimension_numbers = #tpu.dot_dimension_numbers<[1], [0], [0], [1], [0, 0, 1, 1], [], []>} : vector<64x32xbf16>, vector<32x32xbf16>, vector<64x32xf32> -> vector<64x32xf32>
    %c0_3 = arith.constant 0 : index
    %c0_4 = arith.constant 0 : index
    %3 = vector.load %arg3[%c0_3, %c0_4] : memref<1x32xf32, #tpu.memory_space<vmem>>, vector<1x32xf32>
    %4 = vector.broadcast %3 : vector<1x32xf32> to vector<64x32xf32>
    %5 = arith.addf %2, %4 : vector<64x32xf32>
    %c0_5 = arith.constant 0 : index
    %c0_6 = arith.constant 0 : index
    %6 = vector.load %arg4[%c0_5, %c0_6] : memref<64x32xf32, #tpu.memory_space<vmem>>, vector<64x32xf32>
    tpu.vector_store %arg4[%c0_5, %c0_6], %5 {strides = array<i32>} : memref<64x32xf32, #tpu.memory_space<vmem>>, vector<64x32xf32>,
    return
  }
  func.func @transform_0(%arg0: i32) -> (i32, i32) {
    %c0_i32 = arith.constant 0 : i32
    %c0_i32_0 = arith.constant 0 : i32
    return %arg0, %c0_i32 : i32, i32
  }
  func.func @transform_1(%arg0: i32) -> (i32, i32) {
    %c0_i32 = arith.constant 0 : i32
    %c0_i32_0 = arith.constant 0 : i32
    %c0_i32_1 = arith.constant 0 : i32
    return %c0_i32, %c0_i32_0 : i32, i32
  }
  func.func @transform_2(%arg0: i32) -> (i32, i32) {
    %c0_i32 = arith.constant 0 : i32
    %c0_i32_0 = arith.constant 0 : i32
    %c0_i32_1 = arith.constant 0 : i32
    return %c0_i32, %c0_i32_0 : i32, i32
  }
  func.func @transform_3(%arg0: i32) -> (i32, i32) {
    %c0_i32 = arith.constant 0 : i32
    %c0_i32_0 = arith.constant 0 : i32
    return %arg0, %c0_i32 : i32, i32
  }
}

</mosaic_0001>

<bundles_post_ra>
// kernel: row_self_attention_forward.3
= control target key start
LH: loop header
LB: loop body
LE: loop exit
PB: predicated region body
PF: predicated region fallthrough
CT: control target
= control target key end

     0   :  { %vm66_vm0 = vcmask 261120   ;;  %vm176_vm1 = vcmask 781312   ;;  %s317_s1 = inlined_call_operand.vmem [shape: bf16[32,96], index: 1, kind: input, shape index: {}]   ;;  %s318_s0 = inlined_call_operand.vmem [shape: bf16[64,32], index: 0, kind: input, shape index: {}]   ;;  %s319_s2 = inlined_call_operand.vmem [shape: f32[1,96], index: 2, kind: input, shape index: {}]   ;;  %s320_s3 = inlined_call_operand.vmem [shape: bf16[64,96], index: 3, kind: output, shape index: {}]  }
   0x1   :  { %v238_v0 = vld [vmem:[%s317_s1 + $0x8] sm:$0xff]   ;;  %v239_v1 = vld [vmem:[%s317_s1] sm:$0xff]   ;;  %v241_v3 = vld [vmem:[%s318_s0 + $0x10] sm:$0xff]  }
   0x2   :  { %222 = vmatprep.subr.bf16.mxu0 %v238_v0  ;;  %234 = vmatprep.subr.bf16.mxu1 %v238_v0  ;;  %v240_v2 = vld [vmem:[%s318_s0] sm:$0xff]   ;;  %v242_v4 = vld [vmem:[%s318_s0 + $0x8] sm:$0xff]   ;;  %v243_v5 = vld [vmem:[%s318_s0 + $0x18] sm:$0xff]  }
   0x3   :  { %223 = vmatpush3.bf16.msra.mxu0 %v238_v0  ;;  %236 = vmatpush3.bf16.msra.mxu1 %v238_v0  ;;  %v189_v6 = vld [vmem:[%s319_s2] ss:$0 sm:$0xff] }
   0x4   :  { %224 = vmatprep.subr.bf16.mxu0 %v239_v1  ;;  %235 = vmatprep.subr.bf16.mxu1 %v239_v1 }
   0x5   :  { %226 = vmatprep.mubr.msk.bf16.mxu0 %vm66_vm0, %v240_v2  ;;  %230 = vmatprep.mubr.msk.bf16.mxu1 %vm66_vm0, %v241_v3 }
   0x7   :  { %225 = vmatpush3.bf16.msra.mxu0 %v239_v1  ;;  %237 = vmatpush3.bf16.msra.mxu1 %v239_v1 }
   0xa   :  { %227 = vmatmul.mubr.msk.bf16.vlgmr.msra.gmra.mxu0 %vm66_vm0, %v242_v4  ;;  %231 = vmatmul.mubr.msk.bf16.vlgmr.msra.gmra.mxu1 %vm66_vm0, %v243_v5 }
  0xca   :  { %v228_v7 = vpop.f32.mrf.mxu0  ;;  %v232_v8 = vpop.f32.mrf.mxu1 }
  0xcb   :  { %v122_v9 = vadd.f32 %v228_v7, %v189_v6  ;;  %v138_v10 = vadd.f32 %v232_v8, %v189_v6 }
  0xcc   :  { %v113_v11 = vpop.f32.mrf.mxu0  ;;  %v129_v12 = vpop.f32.mrf.mxu1 }
  0xcd   :  { %v210_v13 = vpack.c.bf16 %v122_v9, %v122_v9  ;;  %v214_v14 = vpack.c.bf16 %v138_v10, %v138_v10  ;;  %v114_v15 = vadd.f32 %v189_v6, %v113_v11  ;;  %v130_v16 = vadd.f32 %v189_v6, %v129_v12 }
  0xce   :  { %v229_v17 = vpop.f32.mrf.mxu0  ;;  %v233_v18 = vpop.f32.mrf.mxu1 }
  0xcf   :  { %179 = vst.msk [vmem:[%s320_s3 + $0x8] sm:$0xf] %vm176_vm1, %v210_v13  ;;  %183 = vst.msk [vmem:[%s320_s3 + $0x18] sm:$0xf] %vm176_vm1, %v214_v14  ;;  %v208_v19 = vpack.c.bf16 %v114_v15, %v114_v15  ;;  %v212_v20 = vpack.c.bf16 %v130_v16, %v130_v16  ;;  %v125_v21 = vadd.f32 %v229_v17, %v189_v6 }
  0xd0   :  { %v141_v22 = vadd.f32 %v233_v18, %v189_v6  ;;  %v116_v23 = vpop.f32.mrf.mxu0  ;;  %v132_v24 = vpop.f32.mrf.mxu1 }
  0xd1   :  { %177 = vst.msk [vmem:[%s320_s3] sm:$0xf] %vm176_vm1, %v208_v19  ;;  %181 = vst.msk [vmem:[%s320_s3 + $0x10] sm:$0xf] %vm176_vm1, %v212_v20  ;;  %v211_v25 = vpack.c.bf16 %v125_v21, %v125_v21  ;;  %v117_v27 = vadd.f32 %v189_v6, %v116_v23  ;;  %v133_v28 = vadd.f32 %v189_v6, %v132_v24 }
  0xd2   :  { %v215_v26 = vpack.c.bf16 %v141_v22, %v141_v22 }
  0xd3   :  { %180 = vst.msk [vmem:[%s320_s3 + $0xc] sm:$0xf] %vm176_vm1, %v211_v25  ;;  %v209_v29 = vpack.c.bf16 %v117_v27, %v117_v27  ;;  %v213_v30 = vpack.c.bf16 %v133_v28, %v133_v28 }
  0xd4   :  { %184 = vst.msk [vmem:[%s320_s3 + $0x1c] sm:$0xf] %vm176_vm1, %v215_v26 }
  0xd5   :  { %178 = vst.msk [vmem:[%s320_s3 + $0x4] sm:$0xf] %vm176_vm1, %v209_v29  ;;  %182 = vst.msk [vmem:[%s320_s3 + $0x14] sm:$0xf] %vm176_vm1, %v213_v30 }

// kernel: squeeze.3
= control target key start
LH: loop header
LB: loop body
LE: loop exit
PB: predicated region body
PF: predicated region fallthrough
CT: control target
= control target key end

     0   :  { %vm1028_vm0 = vcmask 1047556   ;;  %s1646_s11 = smov 16   ;;  %vm1030_vm1 = vcmask 64512   ;;  %s1647_s12 = smov 8   ;;  %vm1103_vm2 = vcmask 261312   ;;  %vm1190_vm3 = vcmask 195712   ;;  %s1809_s0 = inlined_call_operand.vmem [shape: bf16[1,4,2,8,4,8], index: 0, kind: input, shape index: {}]   ;;  %s1810_s1 = inlined_call_operand.vmem [shape: bf16[8,8,32], index: 1, kind: output, shape index: {}]  }
   0x1   :  { %v1661_v0 = vld [vmem:[%s1809_s0 + $0x4e] sm:$0xff]   ;;  %v1514_v1 = vld [vmem:[%s1809_s0 + $0x46] sm:$0xff]   ;;  %v1518_v2 = vld [vmem:[%s1809_s0 + $0x3e] sm:$0xff]   ;;  %vm1277_vm4 = vcmask 130112  }
   0x2   :  { %v402_v3 = vunpack.c.l.bf16 %v1661_v0  ;;  %v418_v4 = vunpack.c.h.bf16 %v1514_v1  ;;  %v450_v5 = vunpack.c.l.bf16 %v1514_v1  ;;  %v1673_v6 = vld [vmem:[%s1809_s0 + $0xe] sm:$0xff]   ;;  %v1546_v7 = vld [vmem:[%s1809_s0 + $0x6] sm:$0xff]   ;;  %v1550_v8 = vld [vmem:[%s1809_s0 + $0x2] ss:$84 sps:$4 sm:$0xff]   ;;  %v482_v9 = vunpack.c.h.bf16 %v1518_v2 }
   0x3   :  { %v514_v10 = vunpack.c.l.bf16 %v1518_v2  ;;  %v1022_v11 = vld [vmem:[%s1809_s0] ss:$114 sps:$2 sm:$0xf]   ;;  %v1497_v12 = vld [vmem:[%s1809_s0 + $0x6a] sm:$0xff]   ;;  %v1500_v13 = vld [vmem:[%s1809_s0 + $0x62] sm:$0xff]   ;;  %v914_v14 = vunpack.c.l.bf16 %v1673_v6  ;;  %v930_v15 = vunpack.c.h.bf16 %v1546_v7  ;;  %v962_v16 = vunpack.c.l.bf16 %v1546_v7 }
   0x4   :  { %405 = vst [vmem:[#allocation1 + $0x138] ss:$8 sps:$4 sm:$0xff] %v402_v3   ;;  %421 = vst [vmem:[#allocation1 + $0x128] ss:$8 sps:$4 sm:$0xff] %v418_v4   ;;  %v1504_v17 = vld [vmem:[%s1809_s0 + $0x5a] sm:$0xff]   ;;  %v994_v18 = vunpack.c.l.bf16 %v1550_v8  ;;  %v1023_v19 = vunpack.c.l.bf16 %v1022_v11  ;;  %v1697_v20 = vld [vmem:[%s1809_s0 + $0x2e] sm:$0xff]   ;;  %v146_v22 = vunpack.c.h.bf16 %v1497_v12  ;;  %v162_v23 = vunpack.c.l.bf16 %v1497_v12 }
   0x5   :  { %453 = vst [vmem:[#allocation1 + $0x118] ss:$8 sps:$4 sm:$0xff] %v450_v5   ;;  %485 = vst [vmem:[#allocation1 + $0x108] ss:$8 sps:$4 sm:$0xff] %v482_v9   ;;  %v1530_v21 = vld [vmem:[%s1809_s0 + $0x26] sm:$0xff]   ;;  %v194_v24 = vunpack.c.h.bf16 %v1500_v13  ;;  %v1534_v25 = vld [vmem:[%s1809_s0 + $0x1e] sm:$0xff]   ;;  %v226_v26 = vunpack.c.l.bf16 %v1500_v13  ;;  %v258_v27 = vunpack.c.h.bf16 %v1504_v17  ;;  %v658_v28 = vunpack.c.l.bf16 %v1697_v20 }
   0x6   :  { %517 = vst [vmem:[#allocation1 + $0xf8] ss:$8 sps:$4 sm:$0xff] %v514_v10   ;;  %917 = vst [vmem:[#allocation1 + $0x38] ss:$8 sps:$4 sm:$0xff] %v914_v14   ;;  %v674_v29 = vunpack.c.h.bf16 %v1530_v21  ;;  %v706_v30 = vunpack.c.l.bf16 %v1530_v21  ;;  %v738_v31 = vunpack.c.h.bf16 %v1534_v25  ;;  %v770_v32 = vunpack.c.l.bf16 %v1534_v25  ;;  %v1538_v33 = vld [vmem:[%s1809_s0 + $0x16] sm:$0xff]  }
   0x7   :  { %933 = vst [vmem:[#allocation1 + $0x28] ss:$8 sps:$4 sm:$0xff] %v930_v15   ;;  %965 = vst [vmem:[#allocation1 + $0x18] ss:$8 sps:$4 sm:$0xff] %v962_v16   ;;  %v290_v34 = vunpack.c.l.bf16 %v1504_v17  ;;  %v322_v35 = vunpack.c.h.bf16 %v1550_v8  ;;  %v354_v37 = vunpack.c.h.bf16 %v1661_v0  ;;  %v1489_v38 = vld [vmem:[%s1809_s0 + $0x78] sm:$0xff]   ;;  %v802_v40 = vunpack.c.h.bf16 %v1538_v33 }
   0x8   :  { %997 = vst [vmem:[#allocation1 + $0x8] ss:$8 sps:$4 sm:$0xff] %v994_v18   ;;  %1025 = vst [vmem:[#allocation1] ss:$456 sps:$4 sm:$0xff] %v1023_v19   ;;  %v834_v41 = vunpack.c.l.bf16 %v1538_v33  ;;  %v1493_v42 = vld [vmem:[%s1809_s0 + $0x74] sm:$0xf]   ;;  %v866_v45 = vunpack.c.h.bf16 %v1673_v6  ;;  %v18_v47 = vunpack.c.h.bf16 %v1489_v38  ;;  %v50_v48 = vunpack.c.l.bf16 %v1489_v38 }
   0x9   :  { %149 = vst [vmem:[#allocation1 + $0x1b8] ss:$8 sps:$4 sm:$0xff] %v146_v22   ;;  %165 = vst [vmem:[#allocation1 + $0x1a8] ss:$8 sps:$4 sm:$0xff] %v162_v23   ;;  %v1522_v49 = vld [vmem:[%s1809_s0 + $0x36] sm:$0xff]   ;;  %v82_v52 = vunpack.c.l.bf16 %v1493_v42  ;;  %s1645_s0 = smov 24   ;;  %v610_v60 = vunpack.c.h.bf16 %v1697_v20 }
   0xa   :  { %197 = vst [vmem:[#allocation1 + $0x198] ss:$8 sps:$4 sm:$0xff] %v194_v24   ;;  %229 = vst [vmem:[#allocation1 + $0x188] ss:$8 sps:$4 sm:$0xff] %v226_v26   ;;  %v546_v57 = vunpack.c.h.bf16 %v1522_v49  ;;  %v578_v58 = vunpack.c.l.bf16 %v1522_v49 }
   0xb   :  { %261 = vst [vmem:[#allocation1 + $0x178] ss:$8 sps:$4 sm:$0xff] %v258_v27   ;;  %661 = vst [vmem:[#allocation1 + $0xb8] ss:$8 sps:$4 sm:$0xff] %v658_v28  }
   0xc   :  { %677 = vst [vmem:[#allocation1 + $0xa8] ss:$8 sps:$4 sm:$0xff] %v674_v29   ;;  %709 = vst [vmem:[#allocation1 + $0x98] ss:$8 sps:$4 sm:$0xff] %v706_v30  }
   0xd   :  { %v1108_v36 = vld [vmem:[#allocation1 + $0x103] ss:$8 sm:$0xf0]   ;;  %741 = vst [vmem:[#allocation1 + $0x88] ss:$8 sps:$4 sm:$0xff] %v738_v31  }
   0xe   :  { %773 = vst [vmem:[#allocation1 + $0x78] ss:$8 sps:$4 sm:$0xff] %v770_v32   ;;  %v1106_v39 = vld [vmem:[#allocation1 + $0x103] ss:$8 sm:$0xf]  }
   0xf   :  { %293 = vst [vmem:[#allocation1 + $0x168] ss:$8 sps:$4 sm:$0xff] %v290_v34   ;;  %325 = vst [vmem:[#allocation1 + $0x158] ss:$8 sps:$4 sm:$0xff] %v322_v35   ;;  %v1110_v44 = vsel %vm1028_vm0, %v1108_v36, %v1106_v39 }
  0x10   :  { %v1098_v43 = vld [vmem:[#allocation1 + $0x3] ss:$8 sm:$0xf0]   ;;  %357 = vst [vmem:[#allocation1 + $0x148] ss:$8 sps:$4 sm:$0xff] %v354_v37  }
  0x11   :  { %v1096_v46 = vld [vmem:[#allocation1 + $0x3] ss:$8 sm:$0xf]   ;;  %805 = vst [vmem:[#allocation1 + $0x68] ss:$8 sps:$4 sm:$0xff] %v802_v40  }
  0x12   :  { %837 = vst [vmem:[#allocation1 + $0x58] ss:$8 sps:$4 sm:$0xff] %v834_v41   ;;  %v1100_v50 = vsel %vm1028_vm0, %v1098_v43, %v1096_v46  ;;  %v1152_v51 = vld [vmem:[#allocation1 + $0x183] ss:$8 sm:$0xf0]  }
  0x13   :  { %869 = vst [vmem:[#allocation1 + $0x48] ss:$8 sps:$4 sm:$0xff] %v866_v45   ;;  %v1585_v53 = vpack.i.bf16 %v1110_v44, %v1100_v50  ;;  %v1150_v54 = vld [vmem:[#allocation1 + $0x183] ss:$8 sm:$0xf]  }
  0x14   :  { %21 = vst [vmem:[#allocation1 + $0x1f0] ss:$8 sps:$4 sm:$0xff] %v18_v47   ;;  %53 = vst [vmem:[#allocation1 + $0x1e0] ss:$8 sps:$4 sm:$0xff] %v50_v48   ;;  %v1154_v56 = vsel %vm1028_vm0, %v1152_v51, %v1150_v54 }
  0x15   :  { %v1141_v55 = vld [vmem:[#allocation1 + $0x83] ss:$8 sm:$0xf0]   ;;  %85 = vst [vmem:[#allocation1 + $0x1d0] ss:$8 sps:$4 sm:$0xff] %v82_v52   ;;  %1586 = vrot.lane.b32.xlu0 %v1585_v53, %s1645_s0 }
  0x16   :  { %v1139_v59 = vld [vmem:[#allocation1 + $0x83] ss:$8 sm:$0xf]   ;;  %v1193_v61 = vld [vmem:[#allocation1 + $0x102] ss:$8 sm:$0xf]  }
  0x17   :  { %v1195_v62 = vld [vmem:[#allocation1 + $0x102] ss:$8 sm:$0xf0]   ;;  %v1143_v63 = vsel %vm1028_vm0, %v1141_v55, %v1139_v59  ;;  %v1130_v0 = vld [vmem:[#allocation1 + $0x143] ss:$8 sm:$0xf0]  }
  0x18   :  { %549 = vst [vmem:[#allocation1 + $0xe8] ss:$8 sps:$4 sm:$0xff] %v546_v57   ;;  %581 = vst [vmem:[#allocation1 + $0xd8] ss:$8 sps:$4 sm:$0xff] %v578_v58   ;;  %v1595_v2 = vpack.i.bf16 %v1154_v56, %v1143_v63  ;;  %v1197_v15 = vsel %vm1028_vm0, %v1195_v62, %v1193_v61 }
  0x19   :  { %v1185_v1 = vld [vmem:[#allocation1 + $0x2] ss:$8 sm:$0xf0]   ;;  %v1128_v3 = vld [vmem:[#allocation1 + $0x143] ss:$8 sm:$0xf]  }
  0x1a   :  { %613 = vst [vmem:[#allocation1 + $0xc8] ss:$8 sps:$4 sm:$0xff] %v610_v60   ;;  %v1183_v4 = vld [vmem:[#allocation1 + $0x2] ss:$8 sm:$0xf]   ;;  %v1132_v6 = vsel %vm1028_vm0, %v1130_v0, %v1128_v3  ;;  %1596 = vrot.lane.b32.xlu1 %v1595_v2, %s1645_s0 }
  0x1b   :  { %v1119_v5 = vld [vmem:[#allocation1 + $0x43] ss:$8 sm:$0xf0]   ;;  %v1226_v8 = vld [vmem:[#allocation1 + $0x82] ss:$8 sm:$0xf]   ;;  %v1187_v14 = vsel %vm1028_vm0, %v1185_v1, %v1183_v4 }
  0x1c   :  { %v1117_v7 = vld [vmem:[#allocation1 + $0x43] ss:$8 sm:$0xf]   ;;  %v1228_v9 = vld [vmem:[#allocation1 + $0x82] ss:$8 sm:$0xf0]   ;;  %v1605_v24 = vpack.i.bf16 %v1197_v15, %v1187_v14 }
  0x1d   :  { %v1237_v10 = vld [vmem:[#allocation1 + $0x182] ss:$8 sm:$0xf]   ;;  %v1121_v12 = vsel %vm1028_vm0, %v1119_v5, %v1117_v7  ;;  %v1174_v13 = vld [vmem:[#allocation1 + $0x1c3] ss:$8 sm:$0xf0]   ;;  %v1230_v27 = vsel %vm1028_vm0, %v1228_v9, %v1226_v8 }
  0x1e   :  { %v1239_v11 = vld [vmem:[#allocation1 + $0x182] ss:$8 sm:$0xf0]   ;;  %v1590_v17 = vpack.i.bf16 %v1132_v6, %v1121_v12  ;;  %v1172_v18 = vld [vmem:[#allocation1 + $0x1c3] ss:$8 sm:$0xf]  }
  0x1f   :  { %v1217_v16 = vld [vmem:[#allocation1 + $0x142] ss:$8 sm:$0xf0]   ;;  %v1163_v22 = vld [vmem:[#allocation1 + $0xc3] ss:$8 sm:$0xf0]   ;;  %v1176_v23 = vsel %vm1028_vm0, %v1174_v13, %v1172_v18  ;;  %v1241_v28 = vsel %vm1028_vm0, %v1239_v11, %v1237_v10 }
  0x20   :  { %v1215_v19 = vld [vmem:[#allocation1 + $0x142] ss:$8 sm:$0xf]   ;;  %1591 = vrot.lane.b32.xlu0 %v1590_v17, %s1645_s0  ;;  %v1270_v25 = vld [vmem:[#allocation1 + $0x1] ss:$8 sm:$0xf]   ;;  %v1615_v40 = vpack.i.bf16 %v1241_v28, %v1230_v27 }
  0x21   :  { %v1204_v20 = vld [vmem:[#allocation1 + $0x42] ss:$8 sm:$0xf]   ;;  %v1161_v26 = vld [vmem:[#allocation1 + $0xc3] ss:$8 sm:$0xf]   ;;  %v1219_v34 = vsel %vm1028_vm0, %v1217_v16, %v1215_v19 }
  0x22   :  { %v1206_v21 = vld [vmem:[#allocation1 + $0x42] ss:$8 sm:$0xf0]   ;;  %v1272_v31 = vld [vmem:[#allocation1 + $0x1] ss:$8 sm:$0xf0]   ;;  %v1165_v32 = vsel %vm1028_vm0, %v1163_v22, %v1161_v26 }
  0x23   :  { %v1259_v29 = vld [vmem:[#allocation1 + $0x1c2] ss:$8 sm:$0xf]   ;;  %v1208_v33 = vsel %vm1028_vm0, %v1206_v21, %v1204_v20  ;;  %v1280_v35 = vld [vmem:[#allocation1 + $0x101] ss:$8 sm:$0xf]   ;;  %v1600_v37 = vpack.i.bf16 %v1176_v23, %v1165_v32  ;;  %v1274_v42 = vsel %vm1028_vm0, %v1272_v31, %v1270_v25 }
  0x24   :  { %v1261_v30 = vld [vmem:[#allocation1 + $0x1c2] ss:$8 sm:$0xf0]   ;;  %v1282_v36 = vld [vmem:[#allocation1 + $0x101] ss:$8 sm:$0xf0]   ;;  %1606 = vrot.lane.b32.xlu0 %v1605_v24, %s1646_s11  ;;  %v1610_v41 = vpack.i.bf16 %v1219_v34, %v1208_v33 }
  0x25   :  { %v1248_v38 = vld [vmem:[#allocation1 + $0xc2] ss:$8 sm:$0xf]   ;;  %1601 = vrot.lane.b32.xlu1 %v1600_v37, %s1645_s0  ;;  %v1284_v43 = vsel %vm1028_vm0, %v1282_v36, %v1280_v35  ;;  %v1291_v44 = vld [vmem:[#allocation1 + $0x41] ss:$8 sm:$0xf]   ;;  %v1263_v49 = vsel %vm1028_vm0, %v1261_v30, %v1259_v29 }
  0x26   :  { %v1250_v39 = vld [vmem:[#allocation1 + $0xc2] ss:$8 sm:$0xf0]   ;;  %v1293_v45 = vld [vmem:[#allocation1 + $0x41] ss:$8 sm:$0xf0]   ;;  %v1625_v54 = vpack.i.bf16 %v1284_v43, %v1274_v42 }
  0x27   :  { %v1313_v46 = vld [vmem:[#allocation1 + $0x81] ss:$8 sm:$0xf]   ;;  %v1252_v48 = vsel %vm1028_vm0, %v1250_v39, %v1248_v38  ;;  %v1026_v62 = vld [vmem:[#allocation1] ss:$8 sm:$0xf]   ;;  %v1295_v0 = vsel %vm1028_vm0, %v1293_v45, %v1291_v44 }
  0x28   :  { %v1315_v47 = vld [vmem:[#allocation1 + $0x81] ss:$8 sm:$0xf0]   ;;  %1616 = vrot.lane.b32.xlu0 %v1615_v40, %s1646_s11  ;;  %v1620_v55 = vpack.i.bf16 %v1263_v49, %v1252_v48  ;;  %v1027_v63 = vld [vmem:[#allocation1] ss:$8 sm:$0xf0]  }
  0x29   :  { %v1324_v50 = vld [vmem:[#allocation1 + $0x181] ss:$8 sm:$0xf]   ;;  %1611 = vrot.lane.b32.xlu1 %v1610_v41, %s1646_s11  ;;  %v1317_v56 = vsel %vm1028_vm0, %v1315_v47, %v1313_v46  ;;  %v1029_v2 = vsel %vm1028_vm0, %v1027_v63, %v1026_v62  ;;  %v1060_v3 = vld [vmem:[#allocation1 + $0x100] ss:$8 sm:$0xf]  }
  0x2a   :  { %v1326_v51 = vld [vmem:[#allocation1 + $0x181] ss:$8 sm:$0xf0]   ;;  %1031 = vst.msk [vmem:[#allocation0] sm:$0xff] %vm1030_vm1, %v1029_v2  }
  0x2b   :  { %v1302_v52 = vld [vmem:[#allocation1 + $0x141] ss:$8 sm:$0xf]   ;;  %v1328_v57 = vsel %vm1028_vm0, %v1326_v51, %v1324_v50  ;;  %v1062_v4 = vld [vmem:[#allocation1 + $0x100] ss:$8 sm:$0xf0]  }
  0x2c   :  { %v1304_v53 = vld [vmem:[#allocation1 + $0x141] ss:$8 sm:$0xf0]   ;;  %v1042_v5 = vld [vmem:[#allocation1 + $0x80] ss:$8 sm:$0xf]   ;;  %1626 = vrot.lane.b32.xlu0 %v1625_v54, %s1647_s12  ;;  %v1635_v6 = vpack.i.bf16 %v1328_v57, %v1317_v56  ;;  %v1064_v7 = vsel %vm1028_vm0, %v1062_v4, %v1060_v3 }
  0x2d   :  { %v1335_v58 = vld [vmem:[#allocation1 + $0xc1] ss:$8 sm:$0xf]   ;;  %v1306_v1 = vsel %vm1028_vm0, %v1304_v53, %v1302_v52  ;;  %v1044_v8 = vld [vmem:[#allocation1 + $0x80] ss:$8 sm:$0xf0]   ;;  %1621 = vrot.lane.b32.xlu1 %v1620_v55, %s1646_s11 }
  0x2e   :  { %v1337_v59 = vld [vmem:[#allocation1 + $0xc1] ss:$8 sm:$0xf0]   ;;  %v1078_v9 = vld [vmem:[#allocation1 + $0x180] ss:$8 sm:$0xf]   ;;  %v1630_v10 = vpack.i.bf16 %v1306_v1, %v1295_v0  ;;  %v1046_v11 = vsel %vm1028_vm0, %v1044_v8, %v1042_v5 }
  0x2f   :  { %v1346_v60 = vld [vmem:[#allocation1 + $0x1c1] ss:$8 sm:$0xf]   ;;  %1067 = vst.msk [vmem:[#allocation0 + $0x20] sm:$0xff] %vm1030_vm1, %v1064_v7   ;;  %v1339_v14 = vsel %vm1028_vm0, %v1337_v59, %v1335_v58  ;;  %1049 = vst.msk [vmem:[#allocation0 + $0x10] sm:$0xff] %vm1030_vm1, %v1046_v11  }
  0x30   :  { %v1348_v61 = vld [vmem:[#allocation1 + $0x1c1] ss:$8 sm:$0xf0]   ;;  %v1080_v12 = vld [vmem:[#allocation1 + $0x180] ss:$8 sm:$0xf0]   ;;  %1636 = vrot.lane.b32.xlu0 %v1635_v6, %s1647_s12 }
  0x31   :  { %v1033_v13 = vld [vmem:[#allocation1 + $0x40] ss:$8 sm:$0xf]   ;;  %v1350_v15 = vsel %vm1028_vm0, %v1348_v61, %v1346_v60  ;;  %v1082_v16 = vsel %vm1028_vm0, %v1080_v12, %v1078_v9  ;;  %1631 = vrot.lane.b32.xlu1 %v1630_v10, %s1647_s12 }
  0x32   :  { %v1035_v17 = vld [vmem:[#allocation1 + $0x40] ss:$8 sm:$0xf0]   ;;  %1085 = vst.msk [vmem:[#allocation0 + $0x30] sm:$0xff] %vm1030_vm1, %v1082_v16   ;;  %v1640_v25 = vpack.i.bf16 %v1350_v15, %v1339_v14 }
  0x33   :  { %v1069_v18 = vld [vmem:[#allocation1 + $0x140] ss:$8 sm:$0xf]   ;;  %v1037_v19 = vsel %vm1028_vm0, %v1035_v17, %v1033_v13 }
  0x34   :  { %v1071_v20 = vld [vmem:[#allocation1 + $0x140] ss:$8 sm:$0xf0]   ;;  %1040 = vst.msk [vmem:[#allocation0 + $0x8] sm:$0xff] %vm1030_vm1, %v1037_v19  }
  0x35   :  { %v1051_v21 = vld [vmem:[#allocation1 + $0xc0] ss:$8 sm:$0xf]   ;;  %v1073_v22 = vsel %vm1028_vm0, %v1071_v20, %v1069_v18  ;;  %1641 = vrot.lane.b32.xlu1 %v1640_v25, %s1647_s12 }
  0x36   :  { %v1053_v23 = vld [vmem:[#allocation1 + $0xc0] ss:$8 sm:$0xf0]   ;;  %1076 = vst.msk [vmem:[#allocation0 + $0x28] sm:$0xff] %vm1030_vm1, %v1073_v22  }
  0x37   :  { %v1087_v24 = vld [vmem:[#allocation1 + $0x1c0] ss:$8 sm:$0xf]   ;;  %v1055_v26 = vsel %vm1028_vm0, %v1053_v23, %v1051_v21 }
  0x38   :  { %v1089_v27 = vld [vmem:[#allocation1 + $0x1c0] ss:$8 sm:$0xf0]   ;;  %1058 = vst.msk [vmem:[#allocation0 + $0x18] sm:$0xff] %vm1030_vm1, %v1055_v26  }
  0x39   :  { %v1091_v28 = vsel %vm1028_vm0, %v1089_v27, %v1087_v24 }
  0x3a   :  { %1094 = vst.msk [vmem:[#allocation0 + $0x38] sm:$0xff] %vm1030_vm1, %v1091_v28  }
  0x87   :  { %v1587_v29 = vpop.permute.xlu0 %1586 }
  0x88   :  { %v1589_v30 = vunpack.i.h.bf16 %v1587_v29  ;;  %v1588_v31 = vunpack.i.l.bf16 %v1587_v29 }
  0x8a   :  { %1104 = vst.msk [vmem:[#allocation0] sm:$0xff] %vm1103_vm2, %v1588_v31   ;;  %1115 = vst.msk [vmem:[#allocation0 + $0x20] sm:$0xff] %vm1103_vm2, %v1589_v30  }
  0x8c   :  { %v1597_v32 = vpop.permute.xlu1 %1596 }
  0x8d   :  { %v1599_v33 = vunpack.i.h.bf16 %v1597_v32  ;;  %v1598_v34 = vunpack.i.l.bf16 %v1597_v32 }
  0x8f   :  { %1148 = vst.msk [vmem:[#allocation0 + $0x10] sm:$0xff] %vm1103_vm2, %v1598_v34   ;;  %1159 = vst.msk [vmem:[#allocation0 + $0x30] sm:$0xff] %vm1103_vm2, %v1599_v33  }
  0x92   :  { %v1592_v35 = vpop.permute.xlu0 %1591 }
  0x93   :  { %v1594_v36 = vunpack.i.h.bf16 %v1592_v35  ;;  %v1593_v37 = vunpack.i.l.bf16 %v1592_v35 }
  0x95   :  { %1126 = vst.msk [vmem:[#allocation0 + $0x8] sm:$0xff] %vm1103_vm2, %v1593_v37   ;;  %1137 = vst.msk [vmem:[#allocation0 + $0x28] sm:$0xff] %vm1103_vm2, %v1594_v36  }
  0x96   :  { %v1607_v38 = vpop.permute.xlu0 %1606 }
  0x97   :  { %v1602_v39 = vpop.permute.xlu1 %1601  ;;  %v1609_v40 = vunpack.i.h.bf16 %v1607_v38  ;;  %v1608_v41 = vunpack.i.l.bf16 %v1607_v38 }
  0x98   :  { %v1604_v42 = vunpack.i.h.bf16 %v1602_v39  ;;  %v1603_v43 = vunpack.i.l.bf16 %v1602_v39 }
  0x99   :  { %1202 = vst.msk [vmem:[#allocation0 + $0x20] sm:$0xff] %vm1190_vm3, %v1609_v40   ;;  %1191 = vst.msk [vmem:[#allocation0] sm:$0xff] %vm1190_vm3, %v1608_v41  }
  0x9a   :  { %1170 = vst.msk [vmem:[#allocation0 + $0x18] sm:$0xff] %vm1103_vm2, %v1603_v43   ;;  %1181 = vst.msk [vmem:[#allocation0 + $0x38] sm:$0xff] %vm1103_vm2, %v1604_v42   ;;  %v1617_v44 = vpop.permute.xlu0 %1616 }
  0x9b   :  { %v1612_v45 = vpop.permute.xlu1 %1611  ;;  %v1619_v46 = vunpack.i.h.bf16 %v1617_v44  ;;  %v1618_v47 = vunpack.i.l.bf16 %v1617_v44 }
  0x9c   :  { %v1614_v48 = vunpack.i.h.bf16 %v1612_v45  ;;  %v1613_v49 = vunpack.i.l.bf16 %v1612_v45 }
  0x9d   :  { %1235 = vst.msk [vmem:[#allocation0 + $0x10] sm:$0xff] %vm1190_vm3, %v1618_v47   ;;  %1246 = vst.msk [vmem:[#allocation0 + $0x30] sm:$0xff] %vm1190_vm3, %v1619_v46  }
  0x9e   :  { %1224 = vst.msk [vmem:[#allocation0 + $0x28] sm:$0xff] %vm1190_vm3, %v1614_v48   ;;  %1213 = vst.msk [vmem:[#allocation0 + $0x8] sm:$0xff] %vm1190_vm3, %v1613_v49   ;;  %v1627_v50 = vpop.permute.xlu0 %1626 }
  0x9f   :  { %v1622_v51 = vpop.permute.xlu1 %1621  ;;  %v1629_v52 = vunpack.i.h.bf16 %v1627_v50  ;;  %v1628_v53 = vunpack.i.l.bf16 %v1627_v50 }
  0xa0   :  { %v1624_v54 = vunpack.i.h.bf16 %v1622_v51  ;;  %v1623_v55 = vunpack.i.l.bf16 %v1622_v51 }
  0xa1   :  { %1289 = vst.msk [vmem:[#allocation0 + $0x20] sm:$0xff] %vm1277_vm4, %v1629_v52   ;;  %1278 = vst.msk [vmem:[#allocation0] sm:$0xff] %vm1277_vm4, %v1628_v53  }
  0xa2   :  { %1257 = vst.msk [vmem:[#allocation0 + $0x18] sm:$0xff] %vm1190_vm3, %v1623_v55   ;;  %1268 = vst.msk [vmem:[#allocation0 + $0x38] sm:$0xff] %vm1190_vm3, %v1624_v54   ;;  %v1637_v56 = vpop.permute.xlu0 %1636 }
  0xa3   :  { %v1632_v57 = vpop.permute.xlu1 %1631  ;;  %v1639_v58 = vunpack.i.h.bf16 %v1637_v56  ;;  %v1638_v59 = vunpack.i.l.bf16 %v1637_v56 }
  0xa4   :  { %v1634_v60 = vunpack.i.h.bf16 %v1632_v57  ;;  %v1633_v61 = vunpack.i.l.bf16 %v1632_v57 }
  0xa5   :  { %1322 = vst.msk [vmem:[#allocation0 + $0x10] sm:$0xff] %vm1277_vm4, %v1638_v59   ;;  %1333 = vst.msk [vmem:[#allocation0 + $0x30] sm:$0xff] %vm1277_vm4, %v1639_v58  }
  0xa6   :  { %1300 = vst.msk [vmem:[#allocation0 + $0x8] sm:$0xff] %vm1277_vm4, %v1633_v61   ;;  %1311 = vst.msk [vmem:[#allocation0 + $0x28] sm:$0xff] %vm1277_vm4, %v1634_v60  }
  0xa7   :  { %v1642_v62 = vpop.permute.xlu1 %1641 }
  0xa8   :  { %v1644_v63 = vunpack.i.h.bf16 %v1642_v62  ;;  %v1643_v0 = vunpack.i.l.bf16 %v1642_v62  ;;  %v1390_v1 = vld [vmem:[#allocation0 + $0x20] sm:$0xff] }
  0xa9   :  { %v1361_v2 = vld [vmem:[#allocation0] sm:$0xff] }
  0xaa   :  { %1344 = vst.msk [vmem:[#allocation0 + $0x18] sm:$0xff] %vm1277_vm4, %v1643_v0   ;;  %1355 = vst.msk [vmem:[#allocation0 + $0x38] sm:$0xff] %vm1277_vm4, %v1644_v63  }
  0xac   :  { %v1374_v7 = vld [vmem:[#allocation0 + $0x10] sm:$0xff] }
  0xad   :  { %v1367_v3 = vld [vmem:[#allocation0 + $0x8] sm:$0xff]  ;;  %v1406_v8 = vld [vmem:[#allocation0 + $0x30] sm:$0xff] }
  0xae   :  { %v1398_v4 = vld [vmem:[#allocation0 + $0x28] sm:$0xff]  ;;  %v1562_v6 = vpack.c.bf16 %v1367_v3, %v1361_v2 }
  0xaf   :  { %v1572_v5 = vpack.c.bf16 %v1398_v4, %v1390_v1 }
  0xb0   :  { %1563 = vst [vmem:[%s1810_s1] sm:$0xff] %v1562_v6  }
  0xb1   :  { %1580 = vst [vmem:[%s1810_s1 + $0x10] sm:$0xff] %v1572_v5   ;;  %v1382_v9 = vld [vmem:[#allocation0 + $0x18] sm:$0xff] }
  0xb2   :  { %v1414_v10 = vld [vmem:[#allocation0 + $0x38] sm:$0xff]  ;;  %v1567_v11 = vpack.c.bf16 %v1382_v9, %v1374_v7 }
  0xb3   :  { %v1577_v12 = vpack.c.bf16 %v1414_v10, %v1406_v8 }
  0xb4   :  { %1579 = vst [vmem:[%s1810_s1 + $0x8] sm:$0xff] %v1567_v11  }
  0xb5   :  { %1581 = vst [vmem:[%s1810_s1 + $0x18] sm:$0xff] %v1577_v12  }

// kernel: row_self_attention_forward.5
= control target key start
LH: loop header
LB: loop body
LE: loop exit
PB: predicated region body
PF: predicated region fallthrough
CT: control target
= control target key end

     0   :  { %vm67_vm0 = vcmask 261120   ;;  %s292_s0 = inlined_call_operand.vmem [shape: bf16[64,32], index: 0, kind: input, shape index: {}]   ;;  %s293_s1 = inlined_call_operand.vmem [shape: bf16[32,32], index: 1, kind: input, shape index: {}]   ;;  %s294_s2 = inlined_call_operand.vmem [shape: f32[1,32], index: 2, kind: input, shape index: {}]   ;;  %s295_s3 = inlined_call_operand.hbm [shape: f32[64,32], index: 3, kind: output, shape index: {}]  }
   0x1   :  { %v205_v0 = vld [vmem:[%s293_s1 + $0x8] sm:$0xff]   ;;  %v206_v1 = vld [vmem:[%s293_s1] sm:$0xff]   ;;  %v208_v3 = vld [vmem:[%s292_s0 + $0x10] sm:$0xff]  }
   0x2   :  { %186 = vmatprep.subr.bf16.mxu0 %v205_v0  ;;  %198 = vmatprep.subr.bf16.mxu1 %v205_v0  ;;  %v207_v2 = vld [vmem:[%s292_s0] sm:$0xff]   ;;  %v209_v4 = vld [vmem:[%s292_s0 + $0x8] sm:$0xff]   ;;  %v210_v5 = vld [vmem:[%s292_s0 + $0x18] sm:$0xff]  }
   0x3   :  { %187 = vmatpush3.bf16.msra.mxu0 %v205_v0  ;;  %200 = vmatpush3.bf16.msra.mxu1 %v205_v0 }
   0x4   :  { %188 = vmatprep.subr.bf16.mxu0 %v206_v1  ;;  %199 = vmatprep.subr.bf16.mxu1 %v206_v1 }
   0x5   :  { %190 = vmatprep.mubr.msk.bf16.mxu0 %vm67_vm0, %v207_v2  ;;  %194 = vmatprep.mubr.msk.bf16.mxu1 %vm67_vm0, %v208_v3 }
   0x6   :  { %8 = vsyncpa [#allocation3], 0  ;;  %v169_v6 = vld [vmem:[%s294_s2] ss:$0 sm:$0xff]  ;;  %s233_s0 = smov [#allocation2]  }
   0x7   :  { %189 = vmatpush3.bf16.msra.mxu0 %v206_v1  ;;  %201 = vmatpush3.bf16.msra.mxu1 %v206_v1  ;;  %s158_s25 = sshll.u32 %s233_s0, 4  ;;  %s159_s25 = int_to_ptr.vmem [resolvable:$true] %s158_s25 }
   0x8   :  { %s211_s2 = scalar_lea.vmem %s159_s25, 1024  ;;  %p216_p1 = scmp.lt.s32.totalorder %s159_s25, %s159_s25 }
   0x9   :  { %p212_p0 = scmp.ne.s32.totalorder %s159_s25, %s211_s2  ;;  %p217_p2 = scmp.lt.s32.totalorder %s211_s2, %s211_s2 }
   0xa   :  { %191 = vmatmul.mubr.msk.bf16.vlgmr.msra.gmra.mxu0 %vm67_vm0, %v209_v4  ;;  %195 = vmatmul.mubr.msk.bf16.vlgmr.msra.gmra.mxu1 %vm67_vm0, %v210_v5 }
   0xb   :  { %p218_p3 = por %p217_p2, %p216_p1 }
   0xd   :  { %p219_p4 = pnand %p218_p3, %p212_p0 }
  0xca   :  { %v192_v7 = vpop.f32.mrf.mxu0  ;;  %v196_v8 = vpop.f32.mrf.mxu1 }
  0xcb   :  { %v123_v9 = vadd.f32 %v192_v7, %v169_v6  ;;  %v139_v10 = vadd.f32 %v196_v8, %v169_v6 }
  0xcc   :  { %v114_v11 = vpop.f32.mrf.mxu0  ;;  %v130_v12 = vpop.f32.mrf.mxu1 }
  0xcd   :  { %147 = vst.msk [vmem:[#allocation2 + $0x10] sm:$0xff] %vm67_vm0, %v123_v9  ;;  %151 = vst.msk [vmem:[#allocation2 + $0x30] sm:$0xff] %vm67_vm0, %v139_v10  ;;  %v115_v13 = vadd.f32 %v169_v6, %v114_v11  ;;  %v131_v14 = vadd.f32 %v169_v6, %v130_v12 }
  0xce   :  { %v193_v15 = vpop.f32.mrf.mxu0  ;;  %v197_v16 = vpop.f32.mrf.mxu1 }
  0xcf   :  { %145 = vst.msk [vmem:[#allocation2] sm:$0xff] %vm67_vm0, %v115_v13  ;;  %149 = vst.msk [vmem:[#allocation2 + $0x20] sm:$0xff] %vm67_vm0, %v131_v14  ;;  %v126_v17 = vadd.f32 %v193_v15, %v169_v6  ;;  %v142_v18 = vadd.f32 %v197_v16, %v169_v6 }
  0xd0   :  { %v117_v19 = vpop.f32.mrf.mxu0  ;;  %v133_v20 = vpop.f32.mrf.mxu1 }
  0xd1   :  { %148 = vst.msk [vmem:[#allocation2 + $0x18] sm:$0xff] %vm67_vm0, %v126_v17  ;;  %152 = vst.msk [vmem:[#allocation2 + $0x38] sm:$0xff] %vm67_vm0, %v142_v18  ;;  %v118_v21 = vadd.f32 %v169_v6, %v117_v19  ;;  %v134_v22 = vadd.f32 %v169_v6, %v133_v20 }
  0xd3   :  { %146 = vst.msk [vmem:[#allocation2 + $0x8] sm:$0xff] %vm67_vm0, %v118_v21  ;;  %150 = vst.msk [vmem:[#allocation2 + $0x28] sm:$0xff] %vm67_vm0, %v134_v22 }
  0xd4   :  { %222 = shalt.err (!%p219_p4)
}
  0xd5   :  { %s234_s26 = smov 128   ;;  %s235_s27 = smov 8  }
  0xd6   :  { %164 = dma.vmem_to_hbm [thread:$0]  %s159_s25, 1024, %s295_s3, [#allocation3], %s234_s26, %s234_s26, %s235_s27  }
  0xd7   :  { %231 = dma.done.wait [#allocation3], 1024  }
  0xd8   :  { %232 = vsyncadd [#allocation3], 4294966272 }
  0xd9   :  { %168 = vsyncpa [#allocation3], 1 }

// kernel: row_self_attention_forward.4
= control target key start
LH: loop header
LB: loop body
LE: loop exit
PB: predicated region body
PF: predicated region fallthrough
CT: control target
= control target key end

     0   :  { %vm34_vm0 = vcmask 261120   ;;  %v1133_v2 = vmov 0.0   ;;  %vm1134_vm1 = vmmov 0   ;;  %s1394_s0 = inlined_call_operand.vmem [shape: bf16[8,8,32], index: 0, kind: input, shape index: {}]   ;;  %s1395_s1 = inlined_call_operand.vmem [shape: bf16[8,8,32], index: 1, kind: input, shape index: {}]   ;;  %s1396_s2 = inlined_call_operand.vmem [shape: bf16[8,8,32], index: 2, kind: input, shape index: {}]   ;;  %s1397_s3 = inlined_call_operand.hbm [shape: f32[8,8,8], index: 3, kind: output, shape index: {0}]   ;;  %s1398_s4 = inlined_call_operand.vmem [shape: bf16[8,8,32], index: 4, kind: output, shape index: {1}]  }
   0x1   :  { %v26_v0 = vld [vmem:[%s1395_s1] sm:$0xf]  ;;  %v27_v1 = vld [vmem:[%s1395_s1 + $0x4] sm:$0xf]  ;;  %978 = vmatprep.subr.bf16.mxu0 %v1133_v2  ;;  %984 = vmatprep.subr.bf16.mxu1 %v1133_v2  ;;  %v28_v5 = vld [vmem:[%s1395_s1 + $0x8] sm:$0xf] }
   0x2   :  { %v39_v3 = vsel %vm34_vm0, %v26_v0, 0  ;;  %v85_v4 = vsel %vm34_vm0, %v27_v1, 0  ;;  %980 = vmatprep.mubr.msk.bf16.mxu0 %vm1134_vm1, %v1133_v2  ;;  %986 = vmatprep.mubr.msk.bf16.mxu1 %vm1134_vm1, %v1133_v2  ;;  %v29_v6 = vld [vmem:[%s1395_s1 + $0xc] sm:$0xf]  ;;  %v18_v7 = vld [vmem:[%s1394_s0] sm:$0xf] }
   0x3   :  { %979 = vmatpush3.bf16.xpose.msra.mxu0 %v39_v3  ;;  %985 = vmatpush3.bf16.xpose.msra.mxu1 %v85_v4  ;;  %v19_v8 = vld [vmem:[%s1394_s0 + $0x4] sm:$0xf]  ;;  %v131_v9 = vsel %vm34_vm0, %v28_v5, 0  ;;  %v177_v10 = vsel %vm34_vm0, %v29_v6, 0 }
   0x4   :  { %990 = vmatprep.subr.bf16.mxu0 %v1133_v2  ;;  %996 = vmatprep.subr.bf16.mxu1 %v1133_v2 }
   0x5   :  { %10 = vsyncpa [#allocation3], 0  ;;  %v30_v11 = vld [vmem:[%s1395_s1 + $0x10] sm:$0xf]  ;;  %v31_v12 = vld [vmem:[%s1395_s1 + $0x14] sm:$0xf] }
   0x6   :  { %v20_v13 = vld [vmem:[%s1394_s0 + $0x8] sm:$0xf]  ;;  %v21_v14 = vld [vmem:[%s1394_s0 + $0xc] sm:$0xf]  ;;  %v223_v15 = vsel %vm34_vm0, %v30_v11, 0  ;;  %v269_v16 = vsel %vm34_vm0, %v31_v12, 0 }
   0x7   :  { %v32_v17 = vld [vmem:[%s1395_s1 + $0x18] sm:$0xf]  ;;  %v33_v18 = vld [vmem:[%s1395_s1 + $0x1c] sm:$0xf]  ;;  %v22_v19 = vld [vmem:[%s1394_s0 + $0x10] sm:$0xf] }
   0x8   :  { %v23_v20 = vld [vmem:[%s1394_s0 + $0x14] sm:$0xf]  ;;  %v315_v21 = vsel %vm34_vm0, %v32_v17, 0  ;;  %v361_v22 = vsel %vm34_vm0, %v33_v18, 0  ;;  %v24_v23 = vld [vmem:[%s1394_s0 + $0x18] sm:$0xf] }
   0x9   :  { %v25_v24 = vld [vmem:[%s1394_s0 + $0x1c] sm:$0xf]  ;;  %vm411_vm2 = vcmask 64512   ;;  %vm527_vm3 = vcmask 1043456  }
   0xa   :  { %981 = vmatmul.mubr.msk.bf16.vlgmr.msra.gmra.mxu0 %vm34_vm0, %v18_v7  ;;  %987 = vmatmul.mubr.msk.bf16.vlgmr.msra.gmra.mxu1 %vm34_vm0, %v19_v8 }
   0xb   :  { %991 = vmatpush3.bf16.xpose.msra.mxu0 %v131_v9  ;;  %997 = vmatpush3.bf16.xpose.msra.mxu1 %v177_v10 }
   0xc   :  { %992 = vmatprep.mubr.msk.bf16.mxu0 %vm1134_vm1, %v1133_v2  ;;  %998 = vmatprep.mubr.msk.bf16.mxu1 %vm1134_vm1, %v1133_v2 }
   0xd   :  { %1002 = vmatprep.subr.bf16.mxu0 %v1133_v2  ;;  %1008 = vmatprep.subr.bf16.mxu1 %v1133_v2 }
  0x12   :  { %993 = vmatmul.mubr.msk.bf16.vlgmr.msra.gmra.mxu0 %vm34_vm0, %v20_v13  ;;  %999 = vmatmul.mubr.msk.bf16.vlgmr.msra.gmra.mxu1 %vm34_vm0, %v21_v14 }
  0x13   :  { %1003 = vmatpush3.bf16.xpose.msra.mxu0 %v223_v15  ;;  %1009 = vmatpush3.bf16.xpose.msra.mxu1 %v269_v16 }
  0x14   :  { %1004 = vmatprep.mubr.msk.bf16.mxu0 %vm1134_vm1, %v1133_v2  ;;  %1010 = vmatprep.mubr.msk.bf16.mxu1 %vm1134_vm1, %v1133_v2 }
  0x15   :  { %1014 = vmatprep.subr.bf16.mxu0 %v1133_v2  ;;  %1020 = vmatprep.subr.bf16.mxu1 %v1133_v2 }
  0x1a   :  { %1005 = vmatmul.mubr.msk.bf16.vlgmr.msra.gmra.mxu0 %vm34_vm0, %v22_v19  ;;  %1011 = vmatmul.mubr.msk.bf16.vlgmr.msra.gmra.mxu1 %vm34_vm0, %v23_v20 }
  0x1b   :  { %1015 = vmatpush3.bf16.xpose.msra.mxu0 %v315_v21  ;;  %1021 = vmatpush3.bf16.xpose.msra.mxu1 %v361_v22 }
  0x1c   :  { %1016 = vmatprep.mubr.msk.bf16.mxu0 %vm1134_vm1, %v1133_v2  ;;  %1022 = vmatprep.mubr.msk.bf16.mxu1 %vm1134_vm1, %v1133_v2 }
  0x1d   :  { %1026 = vmatprep.subr.bf16.mxu0 %v1133_v2  ;;  %1032 = vmatprep.subr.bf16.mxu1 %v1133_v2 }
  0x22   :  { %1017 = vmatmul.mubr.msk.bf16.vlgmr.msra.gmra.mxu0 %vm34_vm0, %v24_v23  ;;  %1023 = vmatmul.mubr.msk.bf16.vlgmr.msra.gmra.mxu1 %vm34_vm0, %v25_v24 }
  0x23   :  { %1028 = vmatprep.mubr.msk.bf16.mxu0 %vm1134_vm1, %v1133_v2  ;;  %1034 = vmatprep.mubr.msk.bf16.mxu1 %vm1134_vm1, %v1133_v2 }
  0xca   :  { %v75_v25 = vpop.f32.mrf.mxu0  ;;  %v121_v26 = vpop.f32.mrf.mxu1 }
  0xcb   :  { %v403_v27 = vmul.f32 0.17677669, %v75_v25  ;;  %v404_v28 = vmul.f32 0.17677669, %v121_v26 }
  0xcc   :  { %v982_v29 = vpop.f32.mrf.mxu0  ;;  %v988_v30 = vpop.f32.mrf.mxu1 }
  0xcd   :  { %v412_v31 = vsel %vm411_vm2, %v403_v27, -inf  ;;  %v415_v34 = vsel %vm411_vm2, %v404_v28, -inf }
  0xce   :  { %v124_v32 = vpop.f32.mrf.mxu1  ;;  %413 = vmax.xlane.f32.xlu0 %v412_v31  ;;  %v78_v33 = vpop.f32.mrf.mxu0 }
  0xd0   :  { %v983_v35 = vpop.f32.mrf.mxu0  ;;  %v989_v36 = vpop.f32.mrf.mxu1 }
  0xd2   :  { %v213_v37 = vpop.f32.mrf.mxu1  ;;  %416 = vmax.xlane.f32.xlu0 %v415_v34  ;;  %v167_v38 = vpop.f32.mrf.mxu0 }
  0xd3   :  { %v406_v39 = vmul.f32 0.17677669, %v213_v37  ;;  %v405_v40 = vmul.f32 0.17677669, %v167_v38 }
  0xd4   :  { %v994_v41 = vpop.f32.mrf.mxu0  ;;  %v1000_v42 = vpop.f32.mrf.mxu1 }
  0xd5   :  { %v418_v43 = vsel %vm411_vm2, %v405_v40, -inf  ;;  %v421_v46 = vsel %vm411_vm2, %v406_v39, -inf }
  0xd6   :  { %v216_v44 = vpop.f32.mrf.mxu1  ;;  %419 = vmax.xlane.f32.xlu1 %v418_v43  ;;  %v170_v45 = vpop.f32.mrf.mxu0 }
  0xd8   :  { %v995_v47 = vpop.f32.mrf.mxu0  ;;  %v1001_v48 = vpop.f32.mrf.mxu1 }
  0xd9   :  { %v516_v47 = vld [vmem:[%s1396_s2] sm:$0xf]  ;;  %v517_v48 = vld [vmem:[%s1396_s2 + $0x4] sm:$0xf] }
  0xda   :  { %v305_v49 = vpop.f32.mrf.mxu1  ;;  %422 = vmax.xlane.f32.xlu1 %v421_v46  ;;  %v259_v50 = vpop.f32.mrf.mxu0 }
  0xdb   :  { %v408_v51 = vmul.f32 0.17677669, %v305_v49  ;;  %v407_v52 = vmul.f32 0.17677669, %v259_v50 }
  0xdc   :  { %v1006_v53 = vpop.f32.mrf.mxu0  ;;  %v1012_v54 = vpop.f32.mrf.mxu1 }
  0xdd   :  { %v427_v55 = vsel %vm411_vm2, %v408_v51, -inf  ;;  %v424_v56 = vsel %vm411_vm2, %v407_v52, -inf }
  0xde   :  { %v308_v57 = vpop.f32.mrf.mxu1  ;;  %428 = vmax.xlane.f32.xlu1 %v427_v55  ;;  %425 = vmax.xlane.f32.xlu0 %v424_v56  ;;  %v262_v58 = vpop.f32.mrf.mxu0 }
  0xe0   :  { %v1007_v59 = vpop.f32.mrf.mxu0  ;;  %v1013_v60 = vpop.f32.mrf.mxu1 }
  0xe1   :  { %v518_v59 = vld [vmem:[%s1396_s2 + $0x8] sm:$0xf] }
  0xe2   :  { %v351_v61 = vpop.f32.mrf.mxu0  ;;  %v397_v62 = vpop.f32.mrf.mxu1 }
  0xe3   :  { %v409_v63 = vmul.f32 0.17677669, %v351_v61  ;;  %v410_v0 = vmul.f32 0.17677669, %v397_v62 }
  0xe4   :  { %v1018_v1 = vpop.f32.mrf.mxu0  ;;  %v1024_v3 = vpop.f32.mrf.mxu1 }
  0xe5   :  { %v433_v4 = vsel %vm411_vm2, %v410_v0, -inf  ;;  %v430_v5 = vsel %vm411_vm2, %v409_v63, -inf  ;;  %v519_v3 = vld [vmem:[%s1396_s2 + $0xc] sm:$0xf] }
  0xe6   :  { %v400_v6 = vpop.f32.mrf.mxu1  ;;  %434 = vmax.xlane.f32.xlu1 %v433_v4  ;;  %431 = vmax.xlane.f32.xlu0 %v430_v5  ;;  %v354_v7 = vpop.f32.mrf.mxu0 }
  0xe7   :  { %v667_v6 = vsel %vm527_vm3, %v519_v3, 0 }
  0xe8   :  { %v1019_v8 = vpop.f32.mrf.mxu0  ;;  %v1025_v9 = vpop.f32.mrf.mxu1 }
  0xe9   :  { %v520_v8 = vld [vmem:[%s1396_s2 + $0x10] sm:$0xf] }
 0x157   :  { %v414_v10 = vpop.xlane.xlu0 %413 }
 0x158   :  { %v436_v11 = vsub.f32 %v403_v27, %v414_v10 }
 0x15a   :  { %v444_v12 = vmul.f32 1.442695, %v436_v11 }
 0x15b   :  { %v417_v13 = vpop.xlane.xlu0 %416 }
 0x15c   :  { %1079 = vpow2.f32 %v444_v12  ;;  %v437_v14 = vsub.f32 %v404_v28, %v417_v13  ;;  %v713_v13 = vsel %vm527_vm3, %v520_v8, 0 }
 0x15e   :  { %v446_v15 = vmul.f32 1.442695, %v437_v14 }
 0x15f   :  { %v420_v16 = vpop.xlane.xlu1 %419 }
 0x160   :  { %1081 = vpow2.f32 %v446_v15  ;;  %v438_v17 = vsub.f32 %v405_v40, %v420_v16  ;;  %v521_v15 = vld [vmem:[%s1396_s2 + $0x14] sm:$0xf] }
 0x162   :  { %v448_v18 = vmul.f32 1.442695, %v438_v17 }
 0x163   :  { %v423_v19 = vpop.xlane.xlu1 %422 }
 0x164   :  { %1083 = vpow2.f32 %v448_v18  ;;  %v439_v20 = vsub.f32 %v406_v39, %v423_v19  ;;  %v759_v18 = vsel %vm527_vm3, %v521_v15, 0 }
 0x166   :  { %v450_v21 = vmul.f32 1.442695, %v439_v20 }
 0x167   :  { %v429_v22 = vpop.xlane.xlu1 %428  ;;  %v426_v23 = vpop.xlane.xlu0 %425 }
 0x168   :  { %1085 = vpow2.f32 %v450_v21  ;;  %v441_v24 = vsub.f32 %v408_v51, %v429_v22  ;;  %v440_v25 = vsub.f32 %v407_v52, %v426_v23  ;;  %v529_v51 = vsel %vm527_vm3, %v516_v47, 0  ;;  %v522_v22 = vld [vmem:[%s1396_s2 + $0x18] sm:$0xf] }
 0x169   :  { %v1080_v26 = vpop.eup %1079  ;;  %v575_v52 = vsel %vm527_vm3, %v517_v48, 0  ;;  %1027 = vmatpush3.bf16.msra.mxu0 %v529_v51 }
 0x16a   :  { %v454_v27 = vmul.f32 1.442695, %v441_v24  ;;  %v452_v29 = vmul.f32 1.442695, %v440_v25  ;;  %v460_v30 = vsel %vm411_vm2, %v1080_v26, 0.0  ;;  %1033 = vmatpush3.bf16.msra.mxu1 %v575_v52  ;;  %1038 = vmatprep.subr.bf16.mxu0 %v1133_v2  ;;  %v805_v25 = vsel %vm527_vm3, %v522_v22, 0 }
 0x16b   :  { %461 = vadd.xlane.f32.xlu0 %v460_v30  ;;  %1044 = vmatprep.subr.bf16.mxu1 %v1133_v2 }
 0x16c   :  { %1087 = vpow2.f32 %v454_v27 }
 0x16d   :  { %v1082_v28 = vpop.eup %1081  ;;  %1089 = vpow2.f32 %v452_v29 }
 0x16e   :  { %v463_v31 = vsel %vm411_vm2, %v1082_v28, 0.0 }
 0x16f   :  { %464 = vadd.xlane.f32.xlu1 %v463_v31  ;;  %v435_v32 = vpop.xlane.xlu1 %434  ;;  %v432_v33 = vpop.xlane.xlu0 %431 }
 0x170   :  { %v443_v34 = vsub.f32 %v410_v0, %v435_v32  ;;  %v442_v35 = vsub.f32 %v409_v63, %v432_v33  ;;  %v621_v0 = vsel %vm527_vm3, %v518_v59, 0 }
 0x171   :  { %v1084_v36 = vpop.eup %1083 }
 0x172   :  { %v458_v37 = vmul.f32 1.442695, %v443_v34  ;;  %v456_v38 = vmul.f32 1.442695, %v442_v35  ;;  %v466_v39 = vsel %vm411_vm2, %v1084_v36, 0.0 }
 0x173   :  { %467 = vadd.xlane.f32.xlu0 %v466_v39 }
 0x174   :  { %1091 = vpow2.f32 %v458_v37 }
 0x175   :  { %v1268_v40 = vpop.eup %1085  ;;  %1093 = vpow2.f32 %v456_v38 }
 0x176   :  { %v469_v41 = vsel %vm411_vm2, %v1268_v40, 0.0 }
 0x177   :  { %470 = vadd.xlane.f32.xlu1 %v469_v41 }
 0x179   :  { %v1272_v42 = vpop.eup %1087 }
 0x17a   :  { %v1274_v43 = vpop.eup %1089  ;;  %v475_v44 = vsel %vm411_vm2, %v1272_v42, 0.0 }
 0x17b   :  { %476 = vadd.xlane.f32.xlu1 %v475_v44  ;;  %v472_v45 = vsel %vm411_vm2, %v1274_v43, 0.0 }
 0x17c   :  { %473 = vadd.xlane.f32.xlu0 %v472_v45 }
 0x181   :  { %v1280_v46 = vpop.eup %1091 }
 0x182   :  { %v1288_v49 = vpop.eup %1093  ;;  %v481_v50 = vsel %vm411_vm2, %v1280_v46, 0.0 }
 0x183   :  { %482 = vadd.xlane.f32.xlu1 %v481_v50  ;;  %v478_v53 = vsel %vm411_vm2, %v1288_v49, 0.0 }
 0x184   :  { %479 = vadd.xlane.f32.xlu0 %v478_v53 }
 0x1f4   :  { %v462_v54 = vpop.xlane.xlu0 %461 }
 0x1f5   :  { %1095 = vrcp.f32 %v462_v54 }
 0x1f8   :  { %v465_v55 = vpop.xlane.xlu1 %464 }
 0x1f9   :  { %1097 = vrcp.f32 %v465_v55 }
 0x1fc   :  { %v468_v56 = vpop.xlane.xlu0 %467 }
 0x1fd   :  { %1099 = vrcp.f32 %v468_v56 }
 0x200   :  { %v471_v57 = vpop.xlane.xlu1 %470 }
 0x201   :  { %1101 = vrcp.f32 %v471_v57 }
 0x202   :  { %v1096_v58 = vpop.eup %1095 }
 0x203   :  { %v492_v60 = vmul.f32 %v1096_v58, %v1080_v26  ;;  %v523_v26 = vld [vmem:[%s1396_s2 + $0x1c] sm:$0xf]  ;;  %s1135_s2 = smov [#allocation2]  }
 0x204   :  { %v477_v61 = vpop.xlane.xlu1 %476  ;;  %v851_v29 = vsel %vm527_vm3, %v523_v26, 0  ;;  %s915_s9 = sshll.u32 %s1135_s2, 4  ;;  %s916_s9 = int_to_ptr.vmem [resolvable:$true] %s915_s9 }
 0x205   :  { %1103 = vrcp.f32 %v477_v61  ;;  %v474_v62 = vpop.xlane.xlu0 %473  ;;  %500 = vst.msk [vmem:[#allocation2] sm:$0xff] %vm411_vm2, %v492_v60  ;;  %v508_v63 = vpack.c.bf16 %v492_v60, %v492_v60  ;;  %s1111_s10 = scalar_lea.vmem %s916_s9, 1024  ;;  %p1116_p1 = scmp.lt.s32.totalorder %s916_s9, %s916_s9 }
 0x206   :  { %v1098_v1 = vpop.eup %1097  ;;  %1105 = vrcp.f32 %v474_v62  ;;  %p1112_p0 = scmp.ne.s32.totalorder %s916_s9, %s1111_s10  ;;  %p1117_p2 = scmp.lt.s32.totalorder %s1111_s10, %s1111_s10 }
 0x207   :  { %1029 = vmatmul.mubr.msk.bf16.vlgmr.msra.gmra.mxu0 %vm411_vm2, %v508_v63  ;;  %v493_v4 = vmul.f32 %v1098_v1, %v1082_v28 }
 0x208   :  { %1039 = vmatpush3.bf16.msra.mxu0 %v621_v0  ;;  %1040 = vmatprep.mubr.msk.bf16.mxu0 %vm1134_vm1, %v1133_v2  ;;  %p1118_p3 = por %p1117_p2, %p1116_p1 }
 0x209   :  { %501 = vst.msk [vmem:[#allocation2 + $0x8] sm:$0xff] %vm411_vm2, %v493_v4  ;;  %v509_v5 = vpack.c.bf16 %v493_v4, %v493_v4  ;;  %1050 = vmatprep.subr.bf16.mxu0 %v1133_v2 }
 0x20a   :  { %v1100_v7 = vpop.eup %1099  ;;  %p1119_p4 = pnand %p1118_p3, %p1112_p0 }
 0x20b   :  { %1035 = vmatmul.mubr.msk.bf16.vlgmr.msra.gmra.mxu1 %vm411_vm2, %v509_v5  ;;  %v494_v9 = vmul.f32 %v1100_v7, %v1084_v36 }
 0x20c   :  { %1045 = vmatpush3.bf16.msra.mxu1 %v667_v6  ;;  %v483_v10 = vpop.xlane.xlu1 %482  ;;  %1046 = vmatprep.mubr.msk.bf16.mxu1 %vm1134_vm1, %v1133_v2 }
 0x20d   :  { %1107 = vrcp.f32 %v483_v10  ;;  %v480_v11 = vpop.xlane.xlu0 %479  ;;  %502 = vst.msk [vmem:[#allocation2 + $0x10] sm:$0xff] %vm411_vm2, %v494_v9  ;;  %v510_v12 = vpack.c.bf16 %v494_v9, %v494_v9  ;;  %1056 = vmatprep.subr.bf16.mxu1 %v1133_v2 }
 0x20e   :  { %v1102_v14 = vpop.eup %1101  ;;  %1109 = vrcp.f32 %v480_v11 }
 0x20f   :  { %1041 = vmatmul.mubr.msk.bf16.vlgmr.msra.gmra.mxu0 %vm411_vm2, %v510_v12  ;;  %v495_v16 = vmul.f32 %v1102_v14, %v1268_v40 }
 0x210   :  { %1051 = vmatpush3.bf16.msra.mxu0 %v713_v13  ;;  %1052 = vmatprep.mubr.msk.bf16.mxu0 %vm1134_vm1, %v1133_v2 }
 0x211   :  { %503 = vst.msk [vmem:[#allocation2 + $0x18] sm:$0xff] %vm411_vm2, %v495_v16  ;;  %v511_v17 = vpack.c.bf16 %v495_v16, %v495_v16  ;;  %1062 = vmatprep.subr.bf16.mxu0 %v1133_v2 }
 0x212   :  { %v1104_v19 = vpop.eup %1103 }
 0x213   :  { %v1106_v20 = vpop.eup %1105  ;;  %1047 = vmatmul.mubr.msk.bf16.vlgmr.msra.gmra.mxu1 %vm411_vm2, %v511_v17  ;;  %v497_v21 = vmul.f32 %v1104_v19, %v1272_v42 }
 0x214   :  { %1057 = vmatpush3.bf16.msra.mxu1 %v759_v18  ;;  %v496_v23 = vmul.f32 %v1106_v20, %v1274_v43  ;;  %1058 = vmatprep.mubr.msk.bf16.mxu1 %vm1134_vm1, %v1133_v2 }
 0x215   :  { %505 = vst.msk [vmem:[#allocation2 + $0x28] sm:$0xff] %vm411_vm2, %v497_v21  ;;  %1068 = vmatprep.subr.bf16.mxu1 %v1133_v2  ;;  %v513_v27 = vpack.c.bf16 %v497_v21, %v497_v21 }
 0x216   :  { %504 = vst.msk [vmem:[#allocation2 + $0x20] sm:$0xff] %vm411_vm2, %v496_v23  ;;  %v512_v24 = vpack.c.bf16 %v496_v23, %v496_v23 }
 0x218   :  { %1053 = vmatmul.mubr.msk.bf16.vlgmr.msra.gmra.mxu0 %vm411_vm2, %v512_v24 }
 0x219   :  { %1063 = vmatpush3.bf16.msra.mxu0 %v805_v25  ;;  %1064 = vmatprep.mubr.msk.bf16.mxu0 %vm1134_vm1, %v1133_v2 }
 0x21a   :  { %v1108_v30 = vpop.eup %1107 }
 0x21b   :  { %v1110_v28 = vpop.eup %1109  ;;  %v499_v31 = vmul.f32 %v1108_v30, %v1280_v46  ;;  %1059 = vmatmul.mubr.msk.bf16.vlgmr.msra.gmra.mxu1 %vm411_vm2, %v513_v27 }
 0x21c   :  { %v498_v32 = vmul.f32 %v1110_v28, %v1288_v49  ;;  %1069 = vmatpush3.bf16.msra.mxu1 %v851_v29  ;;  %1070 = vmatprep.mubr.msk.bf16.mxu1 %vm1134_vm1, %v1133_v2 }
 0x21d   :  { %507 = vst.msk [vmem:[#allocation2 + $0x38] sm:$0xff] %vm411_vm2, %v499_v31  ;;  %v515_v34 = vpack.c.bf16 %v499_v31, %v499_v31 }
 0x21e   :  { %506 = vst.msk [vmem:[#allocation2 + $0x30] sm:$0xff] %vm411_vm2, %v498_v32  ;;  %v514_v33 = vpack.c.bf16 %v498_v32, %v498_v32 }
 0x220   :  { %1065 = vmatmul.mubr.msk.bf16.vlgmr.msra.gmra.mxu0 %vm411_vm2, %v514_v33 }
 0x223   :  { %1071 = vmatmul.mubr.msk.bf16.vlgmr.msra.gmra.mxu1 %vm411_vm2, %v515_v34 }
 0x224   :  { %1122 = shalt.err (!%p1119_p4)
}
 0x225   :  { %s1136_s11 = smov 128   ;;  %s1137_s12 = smov 8   ;;  %vm901_vm4 = vcmask 257024  }
 0x226   :  { %921 = dma.vmem_to_hbm [thread:$0]  %s916_s9, 1024, %s1397_s3, [#allocation3], %s1136_s11, %s1136_s11, %s1137_s12  }
 0x2c7   :  { %v565_v2 = vpop.f32.mrf.mxu0 }
 0x2c8   :  { %v893_v35 = vpack.c.bf16 %v565_v2, %v565_v2 }
 0x2c9   :  { %v1030_v36 = vpop.f32.mrf.mxu0 }
 0x2ca   :  { %902 = vst.msk [vmem:[%s1398_s4] sm:$0xf] %vm901_vm4, %v893_v35 }
 0x2cb   :  { %v568_v37 = vpop.f32.mrf.mxu0  ;;  %v611_v38 = vpop.f32.mrf.mxu1 }
 0x2cc   :  { %v894_v39 = vpack.c.bf16 %v611_v38, %v611_v38 }
 0x2cd   :  { %v1031_v40 = vpop.f32.mrf.mxu0  ;;  %v1036_v41 = vpop.f32.mrf.mxu1 }
 0x2ce   :  { %903 = vst.msk [vmem:[%s1398_s4 + $0x4] sm:$0xf] %vm901_vm4, %v894_v39 }
 0x2cf   :  { %v614_v42 = vpop.f32.mrf.mxu1  ;;  %v657_v43 = vpop.f32.mrf.mxu0 }
 0x2d0   :  { %v895_v44 = vpack.c.bf16 %v657_v43, %v657_v43 }
 0x2d1   :  { %v1037_v45 = vpop.f32.mrf.mxu1  ;;  %v1042_v46 = vpop.f32.mrf.mxu0 }
 0x2d2   :  { %904 = vst.msk [vmem:[%s1398_s4 + $0x8] sm:$0xf] %vm901_vm4, %v895_v44 }
 0x2d3   :  { %v660_v47 = vpop.f32.mrf.mxu0  ;;  %v703_v48 = vpop.f32.mrf.mxu1 }
 0x2d4   :  { %v896_v49 = vpack.c.bf16 %v703_v48, %v703_v48 }
 0x2d5   :  { %v1043_v50 = vpop.f32.mrf.mxu0  ;;  %v1048_v51 = vpop.f32.mrf.mxu1 }
 0x2d6   :  { %905 = vst.msk [vmem:[%s1398_s4 + $0xc] sm:$0xf] %vm901_vm4, %v896_v49 }
 0x2d7   :  { %v706_v52 = vpop.f32.mrf.mxu1 }
 0x2d8   :  { %v749_v53 = vpop.f32.mrf.mxu0 }
 0x2d9   :  { %v897_v54 = vpack.c.bf16 %v749_v53, %v749_v53  ;;  %v1049_v55 = vpop.f32.mrf.mxu1 }
 0x2da   :  { %v1054_v56 = vpop.f32.mrf.mxu0 }
 0x2db   :  { %906 = vst.msk [vmem:[%s1398_s4 + $0x10] sm:$0xf] %vm901_vm4, %v897_v54  ;;  %v795_v57 = vpop.f32.mrf.mxu1 }
 0x2dc   :  { %v752_v58 = vpop.f32.mrf.mxu0  ;;  %v898_v59 = vpack.c.bf16 %v795_v57, %v795_v57 }
 0x2dd   :  { %v1060_v60 = vpop.f32.mrf.mxu1 }
 0x2de   :  { %907 = vst.msk [vmem:[%s1398_s4 + $0x14] sm:$0xf] %vm901_vm4, %v898_v59  ;;  %v1055_v61 = vpop.f32.mrf.mxu0 }
 0x2df   :  { %v798_v62 = vpop.f32.mrf.mxu1 }
 0x2e0   :  { %v841_v63 = vpop.f32.mrf.mxu0 }
 0x2e1   :  { %v899_v0 = vpack.c.bf16 %v841_v63, %v841_v63  ;;  %v1061_v1 = vpop.f32.mrf.mxu1 }
 0x2e2   :  { %v1066_v3 = vpop.f32.mrf.mxu0 }
 0x2e3   :  { %908 = vst.msk [vmem:[%s1398_s4 + $0x18] sm:$0xf] %vm901_vm4, %v899_v0  ;;  %v887_v4 = vpop.f32.mrf.mxu1 }
 0x2e4   :  { %v844_v5 = vpop.f32.mrf.mxu0  ;;  %v900_v6 = vpack.c.bf16 %v887_v4, %v887_v4 }
 0x2e5   :  { %v1072_v7 = vpop.f32.mrf.mxu1 }
 0x2e6   :  { %909 = vst.msk [vmem:[%s1398_s4 + $0x1c] sm:$0xf] %vm901_vm4, %v900_v6  ;;  %v1067_v8 = vpop.f32.mrf.mxu0 }
 0x2e7   :  { %v890_v9 = vpop.f32.mrf.mxu1 }
 0x2e9   :  { %v1073_v10 = vpop.f32.mrf.mxu1 }
 0x2ea   :  { %1131 = dma.done.wait [#allocation3], 1024  }
 0x2eb   :  { %1132 = vsyncadd [#allocation3], 4294966272 }
 0x2ec   :  { %929 = vsyncpa [#allocation3], 1 }

</bundles_post_ra>
